<compile_context>
chip_gen: v7x
topology: tpu7x:2x2x1
jax: 0.10.0
libtpu: 0.0.40
codegen_flags: <defaults>
</compile_context>

<pallas_src>
import jax
import jax.numpy as jnp
from jax.experimental import pallas as pl
from jax.experimental.pallas import tpu as pltpu  # noqa: F401  (TPU backend assumed)

# Small, module-consistent sizes (hidden chosen so 4*H = 128 = one lane width).
INPUT_SIZE = 8
HIDDEN = 32
OUTPUT = 24
OUTPUT_PAD = 128          # lane-dense padded FC output width
BATCH = 2
SEQ = 8

# ---- weight-slab row layout (all offsets sublane-aligned, i.e. mult. of 8) ----
D, H, G = INPUT_SIZE, HIDDEN, 4 * HIDDEN   # G = 128 = lane width
ROW_WIH0 = 0            # (D, 4H)   rows   0..7
ROW_WHH0 = 8            # (H, 4H)   rows   8..39
ROW_B0 = 40             # (1, 4H)   row   40        (block padded to 48)
ROW_WIH1 = 48           # (H, 4H)   rows  48..79
ROW_WHH1 = 80           # (H, 4H)   rows  80..111
ROW_B1 = 112            # (1, 4H)   row  112        (block padded to 120)
ROW_WFC = 120           # (H, 128)  rows 120..151
ROW_BFC = 152           # (1, 128)  row  152        (block padded to 160)
SLAB_ROWS = 160


def _lstm_cell(gates, c_prev, h):
    """PyTorch LSTM cell update given pre-activation gates (B, 4H).

    Nonlinearities are applied on the full 128-lane gates vreg (2 EUP pushes
    instead of 4), then per-gate lanes are sliced out.
    """
    sig = jax.nn.sigmoid(gates)       # full-vreg EUP
    tnh = jnp.tanh(gates)             # full-vreg EUP
    i = sig[:, 0 * h:1 * h]
    f = sig[:, 1 * h:2 * h]
    g = tnh[:, 2 * h:3 * h]
    o = sig[:, 3 * h:4 * h]
    c_new = f * c_prev + i * g
    h_new = o * jnp.tanh(c_new)
    return h_new, c_new


def lstm_forecaster_kernel(x_ref,      # (T*B, D) whole sequence, time-major flattened
                           w_ref,      # (SLAB_ROWS, 128) packed weights/biases
                           out_ref):   # (B, OUTPUT_PAD)
    TB = x_ref.shape[0]
    B = out_ref.shape[0]
    T = TB // B

    # ---- hoist all weight/bias vreg loads out of the recurrence loop ----
    wih0 = w_ref[ROW_WIH0:ROW_WIH0 + D, :]      # (D, 4H)
    whh0 = w_ref[ROW_WHH0:ROW_WHH0 + H, :]      # (H, 4H)
    b0 = w_ref[ROW_B0:ROW_B0 + 1, :]            # (1, 4H)
    wih1 = w_ref[ROW_WIH1:ROW_WIH1 + H, :]      # (H, 4H)
    whh1 = w_ref[ROW_WHH1:ROW_WHH1 + H, :]      # (H, 4H)
    b1 = w_ref[ROW_B1:ROW_B1 + 1, :]            # (1, 4H)
    wfc = w_ref[ROW_WFC:ROW_WFC + H, :]         # (H, OUTPUT_PAD)
    bfc = w_ref[ROW_BFC:ROW_BFC + 1, :]         # (1, OUTPUT_PAD)

    # ---- single batched layer-0 input projection for all timesteps ----
    # Independent of the recurrence -> one MXU push + one bias broadcast.
    gx_all = jnp.dot(x_ref[...], wih0,
                     preferred_element_type=jnp.float32) + b0      # (T*B, 4H)

    h0 = jnp.zeros((B, H), jnp.float32)
    c0 = jnp.zeros((B, H), jnp.float32)
    h1 = jnp.zeros((B, H), jnp.float32)
    c1 = jnp.zeros((B, H), jnp.float32)

    # Fully unrolled recurrence (T is small and static); state stays in vregs.
    for t in range(T):
        # layer-1 recurrent partial: depends only on h1 from the PREVIOUS
        # step, so it is off this step's dependent chain and can issue early.
        g1_rec = jnp.dot(h1, whh1, preferred_element_type=jnp.float32) + b1

        # ---- layer 0: only h0 @ Whh0 sits on the recurrent critical path ----
        gates0 = gx_all[t * B:(t + 1) * B, :] + jnp.dot(
            h0, whh0, preferred_element_type=jnp.float32)
        h0, c0 = _lstm_cell(gates0, c0, H)

        # ---- layer 1: one dependent matmul (h0 is fresh), no lane-concat ----
        # Inter-layer Dropout(0.2) is identity in eval mode.
        # TODO(synk): training-mode dropout (scaled Bernoulli mask via pltpu PRNG) not implemented.
        gates1 = g1_rec + jnp.dot(h0, wih1,
                                  preferred_element_type=jnp.float32)
        h1, c1 = _lstm_cell(gates1, c1, H)

    # ---- last timestep: dropout (identity, eval) + fc head (lane-dense) ----
    out_ref[...] = jnp.dot(h1, wfc, preferred_element_type=jnp.float32) + bfc


def prepare_params(params):
    """One-time weight preprocessing (run at parameter-load time, not per call).

    Transposes all weights so the kernel computes activations @ W, fuses the
    two LSTM biases, lane-pads the FC head to 128, and packs everything into a
    single (SLAB_ROWS, 128) f32 slab (one input DMA for all weights).
    """
    slab = jnp.zeros((SLAB_ROWS, G), jnp.float32)
    slab = slab.at[ROW_WIH0:ROW_WIH0 + D, :].set(params["w_ih_l0"].T)
    slab = slab.at[ROW_WHH0:ROW_WHH0 + H, :].set(params["w_hh_l0"].T)
    slab = slab.at[ROW_B0, :].set(params["b_ih_l0"] + params["b_hh_l0"])
    slab = slab.at[ROW_WIH1:ROW_WIH1 + H, :].set(params["w_ih_l1"].T)
    slab = slab.at[ROW_WHH1:ROW_WHH1 + H, :].set(params["w_hh_l1"].T)
    slab = slab.at[ROW_B1, :].set(params["b_ih_l1"] + params["b_hh_l1"])
    slab = slab.at[ROW_WFC:ROW_WFC + H, :OUTPUT].set(params["fc_w"].T)
    slab = slab.at[ROW_BFC, :OUTPUT].set(params["fc_b"])
    return slab


def lstm_heat_forecaster(x_btd, w_slab):
    """x_btd: (B, T, D) float32 (PyTorch batch_first).  w_slab: prepare_params
    output.  Returns (B, OUTPUT)."""
    B, T, Din = x_btd.shape

    # time-major, flattened to (T*B, D) so the kernel can do ONE input matmul
    x_flat = jnp.transpose(x_btd, (1, 0, 2)).reshape(T * B, Din).astype(jnp.float32)

    out_pad = pl.pallas_call(
        lstm_forecaster_kernel,
        out_shape=jax.ShapeDtypeStruct((B, OUTPUT_PAD), jnp.float32),
        # single invocation, no grid: whole recurrence runs in one kernel body
        in_specs=[
            pl.BlockSpec((T * B, Din), lambda: (0, 0)),
            pl.BlockSpec((SLAB_ROWS, G), lambda: (0, 0)),
        ],
        out_specs=pl.BlockSpec((B, OUTPUT_PAD), lambda: (0, 0)),
    )(x_flat, w_slab)

    return out_pad[:, :OUTPUT]


def init_params(key, input_size=INPUT_SIZE, hidden=HIDDEN, output=OUTPUT):
    """Deterministic PyTorch-style init: U(-1/sqrt(H), 1/sqrt(H))."""
    ks = jax.random.split(key, 10)
    s = 1.0 / jnp.sqrt(hidden)
    u = lambda k, shape: jax.random.uniform(k, shape, jnp.float32, -s, s)
    return {
        "w_ih_l0": u(ks[0], (4 * hidden, input_size)),
        "w_hh_l0": u(ks[1], (4 * hidden, hidden)),
        "b_ih_l0": u(ks[2], (4 * hidden,)),
        "b_hh_l0": u(ks[3], (4 * hidden,)),
        "w_ih_l1": u(ks[4], (4 * hidden, hidden)),
        "w_hh_l1": u(ks[5], (4 * hidden, hidden)),
        "b_ih_l1": u(ks[6], (4 * hidden,)),
        "b_hh_l1": u(ks[7], (4 * hidden,)),
        "fc_w": u(ks[8], (output, hidden)),
        "fc_b": u(ks[9], (output,)),
    }


def reference_forward(x_btd, params):
    """Plain-JAX reference of the PyTorch forward (eval mode)."""
    B, T, Din = x_btd.shape
    Hh = HIDDEN

    def layer(xs, w_ih, w_hh, b_ih, b_hh):
        def step(carry, x_t):
            h, c = carry
            gates = x_t @ w_ih.T + h @ w_hh.T + b_ih + b_hh
            i = jax.nn.sigmoid(gates[:, 0 * Hh:1 * Hh])
            f = jax.nn.sigmoid(gates[:, 1 * Hh:2 * Hh])
            g = jnp.tanh(gates[:, 2 * Hh:3 * Hh])
            o = jax.nn.sigmoid(gates[:, 3 * Hh:4 * Hh])
            c = f * c + i * g
            h = o * jnp.tanh(c)
            return (h, c), h
        h0 = jnp.zeros((B, Hh), jnp.float32)
        (_, _), hs = jax.lax.scan(step, (h0, h0), xs)
        return hs

    xs = jnp.transpose(x_btd, (1, 0, 2))
    h_l0 = layer(xs, params["w_ih_l0"], params["w_hh_l0"],
                 params["b_ih_l0"], params["b_hh_l0"])
    h_l1 = layer(h_l0, params["w_ih_l1"], params["w_hh_l1"],
                 params["b_ih_l1"], params["b_hh_l1"])
    last = h_l1[-1]                                  # (B, H)
    return last @ params["fc_w"].T + params["fc_b"]  # (B, OUTPUT)


if __name__ == "__main__":
    key = jax.random.PRNGKey(0)
    k_x, k_p = jax.random.split(key)
    x = jax.random.normal(k_x, (BATCH, SEQ, INPUT_SIZE), jnp.float32)
    params = init_params(k_p)

    # One-time weight preprocessing (transposes / fusion / padding / packing).
    w_slab = jax.block_until_ready(prepare_params(params))

    out = lstm_heat_forecaster(x, w_slab)
    out = jax.block_until_ready(out)

    ref = jax.block_until_ready(reference_forward(x, params))
    assert out.shape == (BATCH, OUTPUT)
    assert jnp.allclose(out, ref, atol=1e-4, rtol=1e-4), (
        f"max abs err {jnp.max(jnp.abs(out - ref))}")

    print("KERNEL_OK")
</pallas_src>

<mosaic_0001>
module attributes {stable_mosaic.version = 11 : i64} {
  func.func @lstm_forecaster_kernel(%arg0: memref<16x8xf32, #tpu.memory_space<vmem>>, %arg1: memref<160x128xf32, #tpu.memory_space<vmem>>, %arg2: memref<2x128xf32, #tpu.memory_space<vmem>>) attributes {dimension_semantics = [], scalar_prefetch = 0 : i64, scratch_operands = 0 : i64, tpu.core_type = #tpu.core_type<tc>} {
    %c0 = arith.constant 0 : index
    %c0_0 = arith.constant 0 : index
    %0 = vector.load %arg1[%c0, %c0_0] : memref<160x128xf32, #tpu.memory_space<vmem>>, vector<8x128xf32>
    %c8 = arith.constant 8 : index
    %c0_1 = arith.constant 0 : index
    %1 = vector.load %arg1[%c8, %c0_1] : memref<160x128xf32, #tpu.memory_space<vmem>>, vector<32x128xf32>
    %c40 = arith.constant 40 : index
    %c0_2 = arith.constant 0 : index
    %2 = vector.load %arg1[%c40, %c0_2] : memref<160x128xf32, #tpu.memory_space<vmem>>, vector<1x128xf32>
    %c48 = arith.constant 48 : index
    %c0_3 = arith.constant 0 : index
    %3 = vector.load %arg1[%c48, %c0_3] : memref<160x128xf32, #tpu.memory_space<vmem>>, vector<32x128xf32>
    %c80 = arith.constant 80 : index
    %c0_4 = arith.constant 0 : index
    %4 = vector.load %arg1[%c80, %c0_4] : memref<160x128xf32, #tpu.memory_space<vmem>>, vector<32x128xf32>
    %c112 = arith.constant 112 : index
    %c0_5 = arith.constant 0 : index
    %5 = vector.load %arg1[%c112, %c0_5] : memref<160x128xf32, #tpu.memory_space<vmem>>, vector<1x128xf32>
    %c120 = arith.constant 120 : index
    %c0_6 = arith.constant 0 : index
    %6 = vector.load %arg1[%c120, %c0_6] : memref<160x128xf32, #tpu.memory_space<vmem>>, vector<32x128xf32>
    %c152 = arith.constant 152 : index
    %c0_7 = arith.constant 0 : index
    %7 = vector.load %arg1[%c152, %c0_7] : memref<160x128xf32, #tpu.memory_space<vmem>>, vector<1x128xf32>
    %c0_8 = arith.constant 0 : index
    %c0_9 = arith.constant 0 : index
    %8 = vector.load %arg0[%c0_8, %c0_9] : memref<16x8xf32, #tpu.memory_space<vmem>>, vector<16x8xf32>
    %cst = arith.constant dense<0.000000e+00> : vector<16x128xf32>
    %9 = tpu.matmul %8, %0, %cst {dimension_numbers = #tpu.dot_dimension_numbers<[1], [0], [0], [1], [0, 0, 1, 1], [], []>} : vector<16x8xf32>, vector<8x128xf32>, vector<16x128xf32> -> vector<16x128xf32>
    %10 = vector.broadcast %2 : vector<1x128xf32> to vector<16x128xf32>
    %11 = arith.addf %9, %10 : vector<16x128xf32>
    %cst_10 = arith.constant 0.000000e+00 : f32
    %12 = vector.broadcast %cst_10 : f32 to vector<2x32xf32>
    %cst_11 = arith.constant 0.000000e+00 : f32
    %13 = vector.broadcast %cst_11 : f32 to vector<2x32xf32>
    %cst_12 = arith.constant 0.000000e+00 : f32
    %14 = vector.broadcast %cst_12 : f32 to vector<2x32xf32>
    %cst_13 = arith.constant 0.000000e+00 : f32
    %15 = vector.broadcast %cst_13 : f32 to vector<2x32xf32>
    %cst_14 = arith.constant dense<0.000000e+00> : vector<2x128xf32>
    %16 = tpu.matmul %14, %4, %cst_14 {dimension_numbers = #tpu.dot_dimension_numbers<[1], [0], [0], [1], [0, 0, 1, 1], [], []>} : vector<2x32xf32>, vector<32x128xf32>, vector<2x128xf32> -> vector<2x128xf32>
    %17 = vector.broadcast %5 : vector<1x128xf32> to vector<2x128xf32>
    %18 = arith.addf %16, %17 : vector<2x128xf32>
    %19 = vector.extract_strided_slice %11 {offsets = [0, 0], sizes = [2, 128], strides = [1, 1]} : vector<16x128xf32> to vector<2x128xf32>
    %cst_15 = arith.constant dense<0.000000e+00> : vector<2x128xf32>
    %20 = tpu.matmul %12, %1, %cst_15 {dimension_numbers = #tpu.dot_dimension_numbers<[1], [0], [0], [1], [0, 0, 1, 1], [], []>} : vector<2x32xf32>, vector<32x128xf32>, vector<2x128xf32> -> vector<2x128xf32>
    %21 = arith.addf %19, %20 : vector<2x128xf32>
    %22 = arith.negf %21 : vector<2x128xf32>
    %23 = math.exp %22 : vector<2x128xf32>
    %cst_16 = arith.constant 1.000000e+00 : f32
    %24 = vector.broadcast %cst_16 : f32 to vector<2x128xf32>
    %25 = arith.addf %24, %23 : vector<2x128xf32>
    %26 = arith.divf %24, %25 : vector<2x128xf32>
    %27 = math.tanh %21 : vector<2x128xf32>
    %28 = vector.extract_strided_slice %26 {offsets = [0, 0], sizes = [2, 32], strides = [1, 1]} : vector<2x128xf32> to vector<2x32xf32>
    %29 = vector.extract_strided_slice %26 {offsets = [0, 32], sizes = [2, 32], strides = [1, 1]} : vector<2x128xf32> to vector<2x32xf32>
    %30 = vector.extract_strided_slice %27 {offsets = [0, 64], sizes = [2, 32], strides = [1, 1]} : vector<2x128xf32> to vector<2x32xf32>
    %31 = vector.extract_strided_slice %26 {offsets = [0, 96], sizes = [2, 32], strides = [1, 1]} : vector<2x128xf32> to vector<2x32xf32>
    %32 = arith.mulf %29, %13 : vector<2x32xf32>
    %33 = arith.mulf %28, %30 : vector<2x32xf32>
    %34 = arith.addf %32, %33 : vector<2x32xf32>
    %35 = math.tanh %34 : vector<2x32xf32>
    %36 = arith.mulf %31, %35 : vector<2x32xf32>
    %cst_17 = arith.constant dense<0.000000e+00> : vector<2x128xf32>
    %37 = tpu.matmul %36, %3, %cst_17 {dimension_numbers = #tpu.dot_dimension_numbers<[1], [0], [0], [1], [0, 0, 1, 1], [], []>} : vector<2x32xf32>, vector<32x128xf32>, vector<2x128xf32> -> vector<2x128xf32>
    %38 = arith.addf %18, %37 : vector<2x128xf32>
    %39 = arith.negf %38 : vector<2x128xf32>
    %40 = math.exp %39 : vector<2x128xf32>
    %cst_18 = arith.constant 1.000000e+00 : f32
    %41 = vector.broadcast %cst_18 : f32 to vector<2x128xf32>
    %42 = arith.addf %41, %40 : vector<2x128xf32>
    %43 = arith.divf %41, %42 : vector<2x128xf32>
    %44 = math.tanh %38 : vector<2x128xf32>
    %45 = vector.extract_strided_slice %43 {offsets = [0, 0], sizes = [2, 32], strides = [1, 1]} : vector<2x128xf32> to vector<2x32xf32>
    %46 = vector.extract_strided_slice %43 {offsets = [0, 32], sizes = [2, 32], strides = [1, 1]} : vector<2x128xf32> to vector<2x32xf32>
    %47 = vector.extract_strided_slice %44 {offsets = [0, 64], sizes = [2, 32], strides = [1, 1]} : vector<2x128xf32> to vector<2x32xf32>
    %48 = vector.extract_strided_slice %43 {offsets = [0, 96], sizes = [2, 32], strides = [1, 1]} : vector<2x128xf32> to vector<2x32xf32>
    %49 = arith.mulf %46, %15 : vector<2x32xf32>
    %50 = arith.mulf %45, %47 : vector<2x32xf32>
    %51 = arith.addf %49, %50 : vector<2x32xf32>
    %52 = math.tanh %51 : vector<2x32xf32>
    %53 = arith.mulf %48, %52 : vector<2x32xf32>
    %cst_19 = arith.constant dense<0.000000e+00> : vector<2x128xf32>
    %54 = tpu.matmul %53, %4, %cst_19 {dimension_numbers = #tpu.dot_dimension_numbers<[1], [0], [0], [1], [0, 0, 1, 1], [], []>} : vector<2x32xf32>, vector<32x128xf32>, vector<2x128xf32> -> vector<2x128xf32>
    %55 = vector.broadcast %5 : vector<1x128xf32> to vector<2x128xf32>
    %56 = arith.addf %54, %55 : vector<2x128xf32>
    %57 = vector.extract_strided_slice %11 {offsets = [2, 0], sizes = [2, 128], strides = [1, 1]} : vector<16x128xf32> to vector<2x128xf32>
    %cst_20 = arith.constant dense<0.000000e+00> : vector<2x128xf32>
    %58 = tpu.matmul %36, %1, %cst_20 {dimension_numbers = #tpu.dot_dimension_numbers<[1], [0], [0], [1], [0, 0, 1, 1], [], []>} : vector<2x32xf32>, vector<32x128xf32>, vector<2x128xf32> -> vector<2x128xf32>
    %59 = arith.addf %57, %58 : vector<2x128xf32>
    %60 = arith.negf %59 : vector<2x128xf32>
    %61 = math.exp %60 : vector<2x128xf32>
    %cst_21 = arith.constant 1.000000e+00 : f32
    %62 = vector.broadcast %cst_21 : f32 to vector<2x128xf32>
    %63 = arith.addf %62, %61 : vector<2x128xf32>
    %64 = arith.divf %62, %63 : vector<2x128xf32>
    %65 = math.tanh %59 : vector<2x128xf32>
    %66 = vector.extract_strided_slice %64 {offsets = [0, 0], sizes = [2, 32], strides = [1, 1]} : vector<2x128xf32> to vector<2x32xf32>
    %67 = vector.extract_strided_slice %64 {offsets = [0, 32], sizes = [2, 32], strides = [1, 1]} : vector<2x128xf32> to vector<2x32xf32>
    %68 = vector.extract_strided_slice %65 {offsets = [0, 64], sizes = [2, 32], strides = [1, 1]} : vector<2x128xf32> to vector<2x32xf32>
    %69 = vector.extract_strided_slice %64 {offsets = [0, 96], sizes = [2, 32], strides = [1, 1]} : vector<2x128xf32> to vector<2x32xf32>
    %70 = arith.mulf %67, %34 : vector<2x32xf32>
    %71 = arith.mulf %66, %68 : vector<2x32xf32>
    %72 = arith.addf %70, %71 : vector<2x32xf32>
    %73 = math.tanh %72 : vector<2x32xf32>
    %74 = arith.mulf %69, %73 : vector<2x32xf32>
    %cst_22 = arith.constant dense<0.000000e+00> : vector<2x128xf32>
    %75 = tpu.matmul %74, %3, %cst_22 {dimension_numbers = #tpu.dot_dimension_numbers<[1], [0], [0], [1], [0, 0, 1, 1], [], []>} : vector<2x32xf32>, vector<32x128xf32>, vector<2x128xf32> -> vector<2x128xf32>
    %76 = arith.addf %56, %75 : vector<2x128xf32>
    %77 = arith.negf %76 : vector<2x128xf32>
    %78 = math.exp %77 : vector<2x128xf32>
    %cst_23 = arith.constant 1.000000e+00 : f32
    %79 = vector.broadcast %cst_23 : f32 to vector<2x128xf32>
    %80 = arith.addf %79, %78 : vector<2x128xf32>
    %81 = arith.divf %79, %80 : vector<2x128xf32>
    %82 = math.tanh %76 : vector<2x128xf32>
    %83 = vector.extract_strided_slice %81 {offsets = [0, 0], sizes = [2, 32], strides = [1, 1]} : vector<2x128xf32> to vector<2x32xf32>
    %84 = vector.extract_strided_slice %81 {offsets = [0, 32], sizes = [2, 32], strides = [1, 1]} : vector<2x128xf32> to vector<2x32xf32>
    %85 = vector.extract_strided_slice %82 {offsets = [0, 64], sizes = [2, 32], strides = [1, 1]} : vector<2x128xf32> to vector<2x32xf32>
    %86 = vector.extract_strided_slice %81 {offsets = [0, 96], sizes = [2, 32], strides = [1, 1]} : vector<2x128xf32> to vector<2x32xf32>
    %87 = arith.mulf %84, %51 : vector<2x32xf32>
    %88 = arith.mulf %83, %85 : vector<2x32xf32>
    %89 = arith.addf %87, %88 : vector<2x32xf32>
    %90 = math.tanh %89 : vector<2x32xf32>
    %91 = arith.mulf %86, %90 : vector<2x32xf32>
    %cst_24 = arith.constant dense<0.000000e+00> : vector<2x128xf32>
    %92 = tpu.matmul %91, %4, %cst_24 {dimension_numbers = #tpu.dot_dimension_numbers<[1], [0], [0], [1], [0, 0, 1, 1], [], []>} : vector<2x32xf32>, vector<32x128xf32>, vector<2x128xf32> -> vector<2x128xf32>
    %93 = vector.broadcast %5 : vector<1x128xf32> to vector<2x128xf32>
    %94 = arith.addf %92, %93 : vector<2x128xf32>
    %95 = vector.extract_strided_slice %11 {offsets = [4, 0], sizes = [2, 128], strides = [1, 1]} : vector<16x128xf32> to vector<2x128xf32>
    %cst_25 = arith.constant dense<0.000000e+00> : vector<2x128xf32>
    %96 = tpu.matmul %74, %1, %cst_25 {dimension_numbers = #tpu.dot_dimension_numbers<[1], [0], [0], [1], [0, 0, 1, 1], [], []>} : vector<2x32xf32>, vector<32x128xf32>, vector<2x128xf32> -> vector<2x128xf32>
    %97 = arith.addf %95, %96 : vector<2x128xf32>
    %98 = arith.negf %97 : vector<2x128xf32>
    %99 = math.exp %98 : vector<2x128xf32>
    %cst_26 = arith.constant 1.000000e+00 : f32
    %100 = vector.broadcast %cst_26 : f32 to vector<2x128xf32>
    %101 = arith.addf %100, %99 : vector<2x128xf32>
    %102 = arith.divf %100, %101 : vector<2x128xf32>
    %103 = math.tanh %97 : vector<2x128xf32>
    %104 = vector.extract_strided_slice %102 {offsets = [0, 0], sizes = [2, 32], strides = [1, 1]} : vector<2x128xf32> to vector<2x32xf32>
    %105 = vector.extract_strided_slice %102 {offsets = [0, 32], sizes = [2, 32], strides = [1, 1]} : vector<2x128xf32> to vector<2x32xf32>
    %106 = vector.extract_strided_slice %103 {offsets = [0, 64], sizes = [2, 32], strides = [1, 1]} : vector<2x128xf32> to vector<2x32xf32>
    %107 = vector.extract_strided_slice %102 {offsets = [0, 96], sizes = [2, 32], strides = [1, 1]} : vector<2x128xf32> to vector<2x32xf32>
    %108 = arith.mulf %105, %72 : vector<2x32xf32>
    %109 = arith.mulf %104, %106 : vector<2x32xf32>
    %110 = arith.addf %108, %109 : vector<2x32xf32>
    %111 = math.tanh %110 : vector<2x32xf32>
    %112 = arith.mulf %107, %111 : vector<2x32xf32>
    %cst_27 = arith.constant dense<0.000000e+00> : vector<2x128xf32>
    %113 = tpu.matmul %112, %3, %cst_27 {dimension_numbers = #tpu.dot_dimension_numbers<[1], [0], [0], [1], [0, 0, 1, 1], [], []>} : vector<2x32xf32>, vector<32x128xf32>, vector<2x128xf32> -> vector<2x128xf32>
    %114 = arith.addf %94, %113 : vector<2x128xf32>
    %115 = arith.negf %114 : vector<2x128xf32>
    %116 = math.exp %115 : vector<2x128xf32>
    %cst_28 = arith.constant 1.000000e+00 : f32
    %117 = vector.broadcast %cst_28 : f32 to vector<2x128xf32>
    %118 = arith.addf %117, %116 : vector<2x128xf32>
    %119 = arith.divf %117, %118 : vector<2x128xf32>
    %120 = math.tanh %114 : vector<2x128xf32>
    %121 = vector.extract_strided_slice %119 {offsets = [0, 0], sizes = [2, 32], strides = [1, 1]} : vector<2x128xf32> to vector<2x32xf32>
    %122 = vector.extract_strided_slice %119 {offsets = [0, 32], sizes = [2, 32], strides = [1, 1]} : vector<2x128xf32> to vector<2x32xf32>
    %123 = vector.extract_strided_slice %120 {offsets = [0, 64], sizes = [2, 32], strides = [1, 1]} : vector<2x128xf32> to vector<2x32xf32>
    %124 = vector.extract_strided_slice %119 {offsets = [0, 96], sizes = [2, 32], strides = [1, 1]} : vector<2x128xf32> to vector<2x32xf32>
    %125 = arith.mulf %122, %89 : vector<2x32xf32>
    %126 = arith.mulf %121, %123 : vector<2x32xf32>
    %127 = arith.addf %125, %126 : vector<2x32xf32>
    %128 = math.tanh %127 : vector<2x32xf32>
    %129 = arith.mulf %124, %128 : vector<2x32xf32>
    %cst_29 = arith.constant dense<0.000000e+00> : vector<2x128xf32>
    %130 = tpu.matmul %129, %4, %cst_29 {dimension_numbers = #tpu.dot_dimension_numbers<[1], [0], [0], [1], [0, 0, 1, 1], [], []>} : vector<2x32xf32>, vector<32x128xf32>, vector<2x128xf32> -> vector<2x128xf32>
    %131 = vector.broadcast %5 : vector<1x128xf32> to vector<2x128xf32>
    %132 = arith.addf %130, %131 : vector<2x128xf32>
    %133 = vector.extract_strided_slice %11 {offsets = [6, 0], sizes = [2, 128], strides = [1, 1]} : vector<16x128xf32> to vector<2x128xf32>
    %cst_30 = arith.constant dense<0.000000e+00> : vector<2x128xf32>
    %134 = tpu.matmul %112, %1, %cst_30 {dimension_numbers = #tpu.dot_dimension_numbers<[1], [0], [0], [1], [0, 0, 1, 1], [], []>} : vector<2x32xf32>, vector<32x128xf32>, vector<2x128xf32> -> vector<2x128xf32>
    %135 = arith.addf %133, %134 : vector<2x128xf32>
    %136 = arith.negf %135 : vector<2x128xf32>
    %137 = math.exp %136 : vector<2x128xf32>
    %cst_31 = arith.constant 1.000000e+00 : f32
    %138 = vector.broadcast %cst_31 : f32 to vector<2x128xf32>
    %139 = arith.addf %138, %137 : vector<2x128xf32>
    %140 = arith.divf %138, %139 : vector<2x128xf32>
    %141 = math.tanh %135 : vector<2x128xf32>
    %142 = vector.extract_strided_slice %140 {offsets = [0, 0], sizes = [2, 32], strides = [1, 1]} : vector<2x128xf32> to vector<2x32xf32>
    %143 = vector.extract_strided_slice %140 {offsets = [0, 32], sizes = [2, 32], strides = [1, 1]} : vector<2x128xf32> to vector<2x32xf32>
    %144 = vector.extract_strided_slice %141 {offsets = [0, 64], sizes = [2, 32], strides = [1, 1]} : vector<2x128xf32> to vector<2x32xf32>
    %145 = vector.extract_strided_slice %140 {offsets = [0, 96], sizes = [2, 32], strides = [1, 1]} : vector<2x128xf32> to vector<2x32xf32>
    %146 = arith.mulf %143, %110 : vector<2x32xf32>
    %147 = arith.mulf %142, %144 : vector<2x32xf32>
    %148 = arith.addf %146, %147 : vector<2x32xf32>
    %149 = math.tanh %148 : vector<2x32xf32>
    %150 = arith.mulf %145, %149 : vector<2x32xf32>
    %cst_32 = arith.constant dense<0.000000e+00> : vector<2x128xf32>
    %151 = tpu.matmul %150, %3, %cst_32 {dimension_numbers = #tpu.dot_dimension_numbers<[1], [0], [0], [1], [0, 0, 1, 1], [], []>} : vector<2x32xf32>, vector<32x128xf32>, vector<2x128xf32> -> vector<2x128xf32>
    %152 = arith.addf %132, %151 : vector<2x128xf32>
    %153 = arith.negf %152 : vector<2x128xf32>
    %154 = math.exp %153 : vector<2x128xf32>
    %cst_33 = arith.constant 1.000000e+00 : f32
    %155 = vector.broadcast %cst_33 : f32 to vector<2x128xf32>
    %156 = arith.addf %155, %154 : vector<2x128xf32>
    %157 = arith.divf %155, %156 : vector<2x128xf32>
    %158 = math.tanh %152 : vector<2x128xf32>
    %159 = vector.extract_strided_slice %157 {offsets = [0, 0], sizes = [2, 32], strides = [1, 1]} : vector<2x128xf32> to vector<2x32xf32>
    %160 = vector.extract_strided_slice %157 {offsets = [0, 32], sizes = [2, 32], strides = [1, 1]} : vector<2x128xf32> to vector<2x32xf32>
    %161 = vector.extract_strided_slice %158 {offsets = [0, 64], sizes = [2, 32], strides = [1, 1]} : vector<2x128xf32> to vector<2x32xf32>
    %162 = vector.extract_strided_slice %157 {offsets = [0, 96], sizes = [2, 32], strides = [1, 1]} : vector<2x128xf32> to vector<2x32xf32>
    %163 = arith.mulf %160, %127 : vector<2x32xf32>
    %164 = arith.mulf %159, %161 : vector<2x32xf32>
    %165 = arith.addf %163, %164 : vector<2x32xf32>
    %166 = math.tanh %165 : vector<2x32xf32>
    %167 = arith.mulf %162, %166 : vector<2x32xf32>
    %cst_34 = arith.constant dense<0.000000e+00> : vector<2x128xf32>
    %168 = tpu.matmul %167, %4, %cst_34 {dimension_numbers = #tpu.dot_dimension_numbers<[1], [0], [0], [1], [0, 0, 1, 1], [], []>} : vector<2x32xf32>, vector<32x128xf32>, vector<2x128xf32> -> vector<2x128xf32>
    %169 = vector.broadcast %5 : vector<1x128xf32> to vector<2x128xf32>
    %170 = arith.addf %168, %169 : vector<2x128xf32>
    %171 = vector.extract_strided_slice %11 {offsets = [8, 0], sizes = [2, 128], strides = [1, 1]} : vector<16x128xf32> to vector<2x128xf32>
    %cst_35 = arith.constant dense<0.000000e+00> : vector<2x128xf32>
    %172 = tpu.matmul %150, %1, %cst_35 {dimension_numbers = #tpu.dot_dimension_numbers<[1], [0], [0], [1], [0, 0, 1, 1], [], []>} : vector<2x32xf32>, vector<32x128xf32>, vector<2x128xf32> -> vector<2x128xf32>
    %173 = arith.addf %171, %172 : vector<2x128xf32>
    %174 = arith.negf %173 : vector<2x128xf32>
    %175 = math.exp %174 : vector<2x128xf32>
    %cst_36 = arith.constant 1.000000e+00 : f32
    %176 = vector.broadcast %cst_36 : f32 to vector<2x128xf32>
    %177 = arith.addf %176, %175 : vector<2x128xf32>
    %178 = arith.divf %176, %177 : vector<2x128xf32>
    %179 = math.tanh %173 : vector<2x128xf32>
    %180 = vector.extract_strided_slice %178 {offsets = [0, 0], sizes = [2, 32], strides = [1, 1]} : vector<2x128xf32> to vector<2x32xf32>
    %181 = vector.extract_strided_slice %178 {offsets = [0, 32], sizes = [2, 32], strides = [1, 1]} : vector<2x128xf32> to vector<2x32xf32>
    %182 = vector.extract_strided_slice %179 {offsets = [0, 64], sizes = [2, 32], strides = [1, 1]} : vector<2x128xf32> to vector<2x32xf32>
    %183 = vector.extract_strided_slice %178 {offsets = [0, 96], sizes = [2, 32], strides = [1, 1]} : vector<2x128xf32> to vector<2x32xf32>
    %184 = arith.mulf %181, %148 : vector<2x32xf32>
    %185 = arith.mulf %180, %182 : vector<2x32xf32>
    %186 = arith.addf %184, %185 : vector<2x32xf32>
    %187 = math.tanh %186 : vector<2x32xf32>
    %188 = arith.mulf %183, %187 : vector<2x32xf32>
    %cst_37 = arith.constant dense<0.000000e+00> : vector<2x128xf32>
    %189 = tpu.matmul %188, %3, %cst_37 {dimension_numbers = #tpu.dot_dimension_numbers<[1], [0], [0], [1], [0, 0, 1, 1], [], []>} : vector<2x32xf32>, vector<32x128xf32>, vector<2x128xf32> -> vector<2x128xf32>
    %190 = arith.addf %170, %189 : vector<2x128xf32>
    %191 = arith.negf %190 : vector<2x128xf32>
    %192 = math.exp %191 : vector<2x128xf32>
    %cst_38 = arith.constant 1.000000e+00 : f32
    %193 = vector.broadcast %cst_38 : f32 to vector<2x128xf32>
    %194 = arith.addf %193, %192 : vector<2x128xf32>
    %195 = arith.divf %193, %194 : vector<2x128xf32>
    %196 = math.tanh %190 : vector<2x128xf32>
    %197 = vector.extract_strided_slice %195 {offsets = [0, 0], sizes = [2, 32], strides = [1, 1]} : vector<2x128xf32> to vector<2x32xf32>
    %198 = vector.extract_strided_slice %195 {offsets = [0, 32], sizes = [2, 32], strides = [1, 1]} : vector<2x128xf32> to vector<2x32xf32>
    %199 = vector.extract_strided_slice %196 {offsets = [0, 64], sizes = [2, 32], strides = [1, 1]} : vector<2x128xf32> to vector<2x32xf32>
    %200 = vector.extract_strided_slice %195 {offsets = [0, 96], sizes = [2, 32], strides = [1, 1]} : vector<2x128xf32> to vector<2x32xf32>
    %201 = arith.mulf %198, %165 : vector<2x32xf32>
    %202 = arith.mulf %197, %199 : vector<2x32xf32>
    %203 = arith.addf %201, %202 : vector<2x32xf32>
    %204 = math.tanh %203 : vector<2x32xf32>
    %205 = arith.mulf %200, %204 : vector<2x32xf32>
    %cst_39 = arith.constant dense<0.000000e+00> : vector<2x128xf32>
    %206 = tpu.matmul %205, %4, %cst_39 {dimension_numbers = #tpu.dot_dimension_numbers<[1], [0], [0], [1], [0, 0, 1, 1], [], []>} : vector<2x32xf32>, vector<32x128xf32>, vector<2x128xf32> -> vector<2x128xf32>
    %207 = vector.broadcast %5 : vector<1x128xf32> to vector<2x128xf32>
    %208 = arith.addf %206, %207 : vector<2x128xf32>
    %209 = vector.extract_strided_slice %11 {offsets = [10, 0], sizes = [2, 128], strides = [1, 1]} : vector<16x128xf32> to vector<2x128xf32>
    %cst_40 = arith.constant dense<0.000000e+00> : vector<2x128xf32>
    %210 = tpu.matmul %188, %1, %cst_40 {dimension_numbers = #tpu.dot_dimension_numbers<[1], [0], [0], [1], [0, 0, 1, 1], [], []>} : vector<2x32xf32>, vector<32x128xf32>, vector<2x128xf32> -> vector<2x128xf32>
    %211 = arith.addf %209, %210 : vector<2x128xf32>
    %212 = arith.negf %211 : vector<2x128xf32>
    %213 = math.exp %212 : vector<2x128xf32>
    %cst_41 = arith.constant 1.000000e+00 : f32
    %214 = vector.broadcast %cst_41 : f32 to vector<2x128xf32>
    %215 = arith.addf %214, %213 : vector<2x128xf32>
    %216 = arith.divf %214, %215 : vector<2x128xf32>
    %217 = math.tanh %211 : vector<2x128xf32>
    %218 = vector.extract_strided_slice %216 {offsets = [0, 0], sizes = [2, 32], strides = [1, 1]} : vector<2x128xf32> to vector<2x32xf32>
    %219 = vector.extract_strided_slice %216 {offsets = [0, 32], sizes = [2, 32], strides = [1, 1]} : vector<2x128xf32> to vector<2x32xf32>
    %220 = vector.extract_strided_slice %217 {offsets = [0, 64], sizes = [2, 32], strides = [1, 1]} : vector<2x128xf32> to vector<2x32xf32>
    %221 = vector.extract_strided_slice %216 {offsets = [0, 96], sizes = [2, 32], strides = [1, 1]} : vector<2x128xf32> to vector<2x32xf32>
    %222 = arith.mulf %219, %186 : vector<2x32xf32>
    %223 = arith.mulf %218, %220 : vector<2x32xf32>
    %224 = arith.addf %222, %223 : vector<2x32xf32>
    %225 = math.tanh %224 : vector<2x32xf32>
    %226 = arith.mulf %221, %225 : vector<2x32xf32>
    %cst_42 = arith.constant dense<0.000000e+00> : vector<2x128xf32>
    %227 = tpu.matmul %226, %3, %cst_42 {dimension_numbers = #tpu.dot_dimension_numbers<[1], [0], [0], [1], [0, 0, 1, 1], [], []>} : vector<2x32xf32>, vector<32x128xf32>, vector<2x128xf32> -> vector<2x128xf32>
    %228 = arith.addf %208, %227 : vector<2x128xf32>
    %229 = arith.negf %228 : vector<2x128xf32>
    %230 = math.exp %229 : vector<2x128xf32>
    %cst_43 = arith.constant 1.000000e+00 : f32
    %231 = vector.broadcast %cst_43 : f32 to vector<2x128xf32>
    %232 = arith.addf %231, %230 : vector<2x128xf32>
    %233 = arith.divf %231, %232 : vector<2x128xf32>
    %234 = math.tanh %228 : vector<2x128xf32>
    %235 = vector.extract_strided_slice %233 {offsets = [0, 0], sizes = [2, 32], strides = [1, 1]} : vector<2x128xf32> to vector<2x32xf32>
    %236 = vector.extract_strided_slice %233 {offsets = [0, 32], sizes = [2, 32], strides = [1, 1]} : vector<2x128xf32> to vector<2x32xf32>
    %237 = vector.extract_strided_slice %234 {offsets = [0, 64], sizes = [2, 32], strides = [1, 1]} : vector<2x128xf32> to vector<2x32xf32>
    %238 = vector.extract_strided_slice %233 {offsets = [0, 96], sizes = [2, 32], strides = [1, 1]} : vector<2x128xf32> to vector<2x32xf32>
    %239 = arith.mulf %236, %203 : vector<2x32xf32>
    %240 = arith.mulf %235, %237 : vector<2x32xf32>
    %241 = arith.addf %239, %240 : vector<2x32xf32>
    %242 = math.tanh %241 : vector<2x32xf32>
    %243 = arith.mulf %238, %242 : vector<2x32xf32>
    %cst_44 = arith.constant dense<0.000000e+00> : vector<2x128xf32>
    %244 = tpu.matmul %243, %4, %cst_44 {dimension_numbers = #tpu.dot_dimension_numbers<[1], [0], [0], [1], [0, 0, 1, 1], [], []>} : vector<2x32xf32>, vector<32x128xf32>, vector<2x128xf32> -> vector<2x128xf32>
    %245 = vector.broadcast %5 : vector<1x128xf32> to vector<2x128xf32>
    %246 = arith.addf %244, %245 : vector<2x128xf32>
    %247 = vector.extract_strided_slice %11 {offsets = [12, 0], sizes = [2, 128], strides = [1, 1]} : vector<16x128xf32> to vector<2x128xf32>
    %cst_45 = arith.constant dense<0.000000e+00> : vector<2x128xf32>
    %248 = tpu.matmul %226, %1, %cst_45 {dimension_numbers = #tpu.dot_dimension_numbers<[1], [0], [0], [1], [0, 0, 1, 1], [], []>} : vector<2x32xf32>, vector<32x128xf32>, vector<2x128xf32> -> vector<2x128xf32>
    %249 = arith.addf %247, %248 : vector<2x128xf32>
    %250 = arith.negf %249 : vector<2x128xf32>
    %251 = math.exp %250 : vector<2x128xf32>
    %cst_46 = arith.constant 1.000000e+00 : f32
    %252 = vector.broadcast %cst_46 : f32 to vector<2x128xf32>
    %253 = arith.addf %252, %251 : vector<2x128xf32>
    %254 = arith.divf %252, %253 : vector<2x128xf32>
    %255 = math.tanh %249 : vector<2x128xf32>
    %256 = vector.extract_strided_slice %254 {offsets = [0, 0], sizes = [2, 32], strides = [1, 1]} : vector<2x128xf32> to vector<2x32xf32>
    %257 = vector.extract_strided_slice %254 {offsets = [0, 32], sizes = [2, 32], strides = [1, 1]} : vector<2x128xf32> to vector<2x32xf32>
    %258 = vector.extract_strided_slice %255 {offsets = [0, 64], sizes = [2, 32], strides = [1, 1]} : vector<2x128xf32> to vector<2x32xf32>
    %259 = vector.extract_strided_slice %254 {offsets = [0, 96], sizes = [2, 32], strides = [1, 1]} : vector<2x128xf32> to vector<2x32xf32>
    %260 = arith.mulf %257, %224 : vector<2x32xf32>
    %261 = arith.mulf %256, %258 : vector<2x32xf32>
    %262 = arith.addf %260, %261 : vector<2x32xf32>
    %263 = math.tanh %262 : vector<2x32xf32>
    %264 = arith.mulf %259, %263 : vector<2x32xf32>
    %cst_47 = arith.constant dense<0.000000e+00> : vector<2x128xf32>
    %265 = tpu.matmul %264, %3, %cst_47 {dimension_numbers = #tpu.dot_dimension_numbers<[1], [0], [0], [1], [0, 0, 1, 1], [], []>} : vector<2x32xf32>, vector<32x128xf32>, vector<2x128xf32> -> vector<2x128xf32>
    %266 = arith.addf %246, %265 : vector<2x128xf32>
    %267 = arith.negf %266 : vector<2x128xf32>
    %268 = math.exp %267 : vector<2x128xf32>
    %cst_48 = arith.constant 1.000000e+00 : f32
    %269 = vector.broadcast %cst_48 : f32 to vector<2x128xf32>
    %270 = arith.addf %269, %268 : vector<2x128xf32>
    %271 = arith.divf %269, %270 : vector<2x128xf32>
    %272 = math.tanh %266 : vector<2x128xf32>
    %273 = vector.extract_strided_slice %271 {offsets = [0, 0], sizes = [2, 32], strides = [1, 1]} : vector<2x128xf32> to vector<2x32xf32>
    %274 = vector.extract_strided_slice %271 {offsets = [0, 32], sizes = [2, 32], strides = [1, 1]} : vector<2x128xf32> to vector<2x32xf32>
    %275 = vector.extract_strided_slice %272 {offsets = [0, 64], sizes = [2, 32], strides = [1, 1]} : vector<2x128xf32> to vector<2x32xf32>
    %276 = vector.extract_strided_slice %271 {offsets = [0, 96], sizes = [2, 32], strides = [1, 1]} : vector<2x128xf32> to vector<2x32xf32>
    %277 = arith.mulf %274, %241 : vector<2x32xf32>
    %278 = arith.mulf %273, %275 : vector<2x32xf32>
    %279 = arith.addf %277, %278 : vector<2x32xf32>
    %280 = math.tanh %279 : vector<2x32xf32>
    %281 = arith.mulf %276, %280 : vector<2x32xf32>
    %cst_49 = arith.constant dense<0.000000e+00> : vector<2x128xf32>
    %282 = tpu.matmul %281, %4, %cst_49 {dimension_numbers = #tpu.dot_dimension_numbers<[1], [0], [0], [1], [0, 0, 1, 1], [], []>} : vector<2x32xf32>, vector<32x128xf32>, vector<2x128xf32> -> vector<2x128xf32>
    %283 = vector.broadcast %5 : vector<1x128xf32> to vector<2x128xf32>
    %284 = arith.addf %282, %283 : vector<2x128xf32>
    %285 = vector.extract_strided_slice %11 {offsets = [14, 0], sizes = [2, 128], strides = [1, 1]} : vector<16x128xf32> to vector<2x128xf32>
    %cst_50 = arith.constant dense<0.000000e+00> : vector<2x128xf32>
    %286 = tpu.matmul %264, %1, %cst_50 {dimension_numbers = #tpu.dot_dimension_numbers<[1], [0], [0], [1], [0, 0, 1, 1], [], []>} : vector<2x32xf32>, vector<32x128xf32>, vector<2x128xf32> -> vector<2x128xf32>
    %287 = arith.addf %285, %286 : vector<2x128xf32>
    %288 = arith.negf %287 : vector<2x128xf32>
    %289 = math.exp %288 : vector<2x128xf32>
    %cst_51 = arith.constant 1.000000e+00 : f32
    %290 = vector.broadcast %cst_51 : f32 to vector<2x128xf32>
    %291 = arith.addf %290, %289 : vector<2x128xf32>
    %292 = arith.divf %290, %291 : vector<2x128xf32>
    %293 = math.tanh %287 : vector<2x128xf32>
    %294 = vector.extract_strided_slice %292 {offsets = [0, 0], sizes = [2, 32], strides = [1, 1]} : vector<2x128xf32> to vector<2x32xf32>
    %295 = vector.extract_strided_slice %292 {offsets = [0, 32], sizes = [2, 32], strides = [1, 1]} : vector<2x128xf32> to vector<2x32xf32>
    %296 = vector.extract_strided_slice %293 {offsets = [0, 64], sizes = [2, 32], strides = [1, 1]} : vector<2x128xf32> to vector<2x32xf32>
    %297 = vector.extract_strided_slice %292 {offsets = [0, 96], sizes = [2, 32], strides = [1, 1]} : vector<2x128xf32> to vector<2x32xf32>
    %298 = arith.mulf %295, %262 : vector<2x32xf32>
    %299 = arith.mulf %294, %296 : vector<2x32xf32>
    %300 = arith.addf %298, %299 : vector<2x32xf32>
    %301 = math.tanh %300 : vector<2x32xf32>
    %302 = arith.mulf %297, %301 : vector<2x32xf32>
    %cst_52 = arith.constant dense<0.000000e+00> : vector<2x128xf32>
    %303 = tpu.matmul %302, %3, %cst_52 {dimension_numbers = #tpu.dot_dimension_numbers<[1], [0], [0], [1], [0, 0, 1, 1], [], []>} : vector<2x32xf32>, vector<32x128xf32>, vector<2x128xf32> -> vector<2x128xf32>
    %304 = arith.addf %284, %303 : vector<2x128xf32>
    %305 = arith.negf %304 : vector<2x128xf32>
    %306 = math.exp %305 : vector<2x128xf32>
    %cst_53 = arith.constant 1.000000e+00 : f32
    %307 = vector.broadcast %cst_53 : f32 to vector<2x128xf32>
    %308 = arith.addf %307, %306 : vector<2x128xf32>
    %309 = arith.divf %307, %308 : vector<2x128xf32>
    %310 = math.tanh %304 : vector<2x128xf32>
    %311 = vector.extract_strided_slice %309 {offsets = [0, 0], sizes = [2, 32], strides = [1, 1]} : vector<2x128xf32> to vector<2x32xf32>
    %312 = vector.extract_strided_slice %309 {offsets = [0, 32], sizes = [2, 32], strides = [1, 1]} : vector<2x128xf32> to vector<2x32xf32>
    %313 = vector.extract_strided_slice %310 {offsets = [0, 64], sizes = [2, 32], strides = [1, 1]} : vector<2x128xf32> to vector<2x32xf32>
    %314 = vector.extract_strided_slice %309 {offsets = [0, 96], sizes = [2, 32], strides = [1, 1]} : vector<2x128xf32> to vector<2x32xf32>
    %315 = arith.mulf %312, %279 : vector<2x32xf32>
    %316 = arith.mulf %311, %313 : vector<2x32xf32>
    %317 = arith.addf %315, %316 : vector<2x32xf32>
    %318 = math.tanh %317 : vector<2x32xf32>
    %319 = arith.mulf %314, %318 : vector<2x32xf32>
    %cst_54 = arith.constant dense<0.000000e+00> : vector<2x128xf32>
    %320 = tpu.matmul %319, %6, %cst_54 {dimension_numbers = #tpu.dot_dimension_numbers<[1], [0], [0], [1], [0, 0, 1, 1], [], []>} : vector<2x32xf32>, vector<32x128xf32>, vector<2x128xf32> -> vector<2x128xf32>
    %321 = vector.broadcast %7 : vector<1x128xf32> to vector<2x128xf32>
    %322 = arith.addf %320, %321 : vector<2x128xf32>
    %c0_55 = arith.constant 0 : index
    %c0_56 = arith.constant 0 : index
    %323 = vector.load %arg2[%c0_55, %c0_56] : memref<2x128xf32, #tpu.memory_space<vmem>>, vector<2x128xf32>
    tpu.vector_store %arg2[%c0_55, %c0_56], %322 {strides = array<i32>} : memref<2x128xf32, #tpu.memory_space<vmem>>, vector<2x128xf32>,
    return
  }
}

</mosaic_0001>

<bundles_post_ra>
// kernel: tpu_custom_call.1
= control target key start
LH: loop header
LB: loop body
LE: loop exit
PB: predicated region body
PF: predicated region fallthrough
CT: control target
= control target key end

     0   :  { %7 = vsyncpa [#allocation3], 0  ;;  %s3625_s0 = inlined_call_operand.vmem [shape: f32[16,8], index: 0, kind: input, shape index: {}]   ;;  %s3626_s1 = inlined_call_operand.hbm [shape: f32[160,128], index: 1, kind: input, shape index: {}]   ;;  %s3627_s2 = inlined_call_operand.hbm [shape: f32[2,128], index: 2, kind: output, shape index: {}]  }
   0x1   :  { %8 = vsyncpa [#allocation4], 0  ;;  %s3248_s9 = smov [#allocation2]   ;;  %s3200_s13 = scalar_lea.hbm %s3626_s1, 2560 }
   0x2   :  { %s16_s10 = sshll.u32 %s3248_s9, 4  ;;  %p3201_p0 = scmp.ne.s32.totalorder %s3626_s1, %s3200_s13  ;;  %s17_s10 = int_to_ptr.vmem [resolvable:$true] %s16_s10 }
   0x3   :  { %p3204_p1 = scmp.lt.u32.totalorder %s3200_s13, %s3626_s1 }
   0x5   :  { %p3206_p2 = pnand %p3204_p1, %p3201_p0 }
   0x7   :  { %3209 = shalt.err (!%p3206_p2)
}
   0x8   :  { %s3210_s18 = scalar_lea.vmem %s17_s10, 2560  ;;  %p3215_p4 = scmp.lt.s32.totalorder %s17_s10, %s17_s10 }
   0x9   :  { %p3211_p3 = scmp.ne.s32.totalorder %s17_s10, %s3210_s18  ;;  %p3216_p5 = scmp.lt.s32.totalorder %s3210_s18, %s3210_s18 }
   0xb   :  { %p3217_p6 = por %p3216_p5, %p3215_p4 }
   0xd   :  { %p3218_p7 = pnand %p3217_p6, %p3211_p3 }
   0xf   :  { %3221 = shalt.err (!%p3218_p7)
}
  0x10   :  { %s3249_s19 = smov 128   ;;  %s3250_s20 = smov 8  }
  0x11   :  { %22 = dma.hbm_to_vmem [thread:$0]  %s3626_s1, 2560, %s17_s10, [#allocation3], %s3249_s19, %s3249_s19, %s3250_s20  }
  0x12   :  { %3244 = dma.done.wait [#allocation3], 2560  }
  0x13   :  { %3245 = vsyncadd [#allocation3], 4294964736  ;;  %v3251_v0 = vmov 0.0|0.0   ;;  %vm3252_vm0 = vmmov 0   ;;  %v3253_v1 = vmov 0.0   ;;  %vm52_vm1 = vcmask 64512  }
  0x14   :  { %2889 = vmatprep.subr.bf16.mxu1 %v3251_v0  ;;  %2622 = vmatprep.mubr.msk.f32.mxu1 %vm3252_vm0, %v3253_v1  ;;  %v26_v2 = vld [vmem:[#allocation2] sm:$0xff]  ;;  %v47_v4 = vld [vmem:[%s3625_s0 + $0x8] sm:$0xff]  ;;  %v28_v6 = vld [vmem:[#allocation2 + $0x10] sm:$0xff]  ;;  %s3255_s1 = smov 32   ;;  %vm138_vm2 = vcmask 261120   ;;  %s3256_s27 = smov [#allocation5]  }
  0x15   :  { %v46_v3 = vld [vmem:[%s3625_s0] sm:$0xff]  ;;  %2609 = vmatprep.subr.mxu0 %v26_v2  ;;  %v27_v5 = vld [vmem:[#allocation2 + $0x8] sm:$0xff]  ;;  %v29_v7 = vld [vmem:[#allocation2 + $0x18] sm:$0xff]  ;;  %s3254_s0 = smov 64   ;;  %s2428_s28 = sshll.u32 %s3256_s27, 4  ;;  %s2429_s28 = int_to_ptr.vmem [resolvable:$true] %s2428_s28 }
  0x16   :  { %2611 = vmatprep.mubr.msk.f32.mxu0 %vm52_vm1, %v46_v3  ;;  %2610 = vmatpush3.msra.mxu0 %v26_v2  ;;  %v3293_v8 = vpack.c.bf16 %v28_v6, %v27_v5  ;;  %v30_v9 = vld [vmem:[#allocation2 + $0x20] sm:$0xff]  ;;  %v2437_v11 = vld [vmem:[#allocation2 + $0x28] ss:$0 sm:$0xff]  ;;  %v36_v29 = vld [vmem:[#allocation2 + $0x50] sm:$0xff]  ;;  %s3222_s29 = scalar_lea.vmem %s2429_s28, 32  ;;  %p3227_p9 = scmp.lt.s32.totalorder %s2429_s28, %s2429_s28 }
  0x17   :  { %2612 = vmatmul.mubr.msk.f32.vlgmr.msra.gmra.mrb[0].mxu0 %vm52_vm1, %v47_v4  ;;  %2895 = vmatprep.subr.bf16.mxu0 %v3251_v0  ;;  %v3297_v10 = vpack.c.bf16 %v30_v9, %v29_v7  ;;  %v37_v30 = vld [vmem:[#allocation2 + $0x58] sm:$0xff]  ;;  %v38_v31 = vld [vmem:[#allocation2 + $0x60] sm:$0xff]  ;;  %v39_v33 = vld [vmem:[#allocation2 + $0x68] sm:$0xff]  ;;  %p3223_p8 = scmp.ne.s32.totalorder %s2429_s28, %s3222_s29  ;;  %p3228_p10 = scmp.lt.s32.totalorder %s3222_s29, %s3222_s29 }
  0x18   :  { %2897 = vmatpush3.bf16.msra.mxu0 %v3293_v8  ;;  %2633 = vmatprep.mubr.msk.f32.mxu0 %vm3252_vm0, %v3253_v1  ;;  %v3317_v32 = vpack.c.bf16 %v37_v30, %v36_v29  ;;  %v3320_v34 = vpack.c.bf16 %v39_v33, %v38_v31  ;;  %v32_v35 = vld [vmem:[#allocation2 + $0x30] sm:$0xff]  ;;  %v33_v36 = vld [vmem:[#allocation2 + $0x38] sm:$0xff]  ;;  %v34_v38 = vld [vmem:[#allocation2 + $0x40] sm:$0xff] }
  0x19   :  { %2898 = vmatprep.subr.bf16.mxu0 %v3251_v0  ;;  %v3326_v37 = vpack.c.bf16 %v33_v36, %v32_v35  ;;  %v35_v39 = vld [vmem:[#allocation2 + $0x48] sm:$0xff]  ;;  %v3356_v45 = vld [vmem:[#allocation2 + $0x70] ss:$0 sm:$0xff]  ;;  %p3229_p11 = por %p3228_p10, %p3227_p9 }
  0x1a   :  { %2891 = vmatpush3.bf16.msra.mxu1 %v3317_v32  ;;  %v3334_v41 = vpack.c.bf16 %v35_v39, %v34_v38 }
  0x1b   :  { %2892 = vmatprep.subr.bf16.mxu1 %v3251_v0  ;;  %p3230_p12 = pnand %p3229_p11, %p3223_p8 }
  0x1c   :  { %2900 = vmatpush3.bf16.msra.mxu0 %v3297_v10 }
  0x1d   :  { %2907 = vmatprep.subr.bf16.mxu0 %v3251_v0 }
  0x1e   :  { %2894 = vmatpush3.bf16.msra.mxu1 %v3320_v34 }
  0x1f   :  { %2634 = vmatmul.mubr.f32.vlgmr.msra.gmra.mrb[2].mxu0 %v3253_v1  ;;  %2901 = vmatprep.subr.bf16.mxu1 %v3251_v0 }
  0x20   :  { %2655 = vmatprep.mubr.msk.f32.mxu0 %vm3252_vm0, %v3253_v1  ;;  %2909 = vmatpush3.bf16.msra.mxu0 %v3317_v32 }
  0x21   :  { %2910 = vmatprep.subr.bf16.mxu0 %v3251_v0  ;;  %2623 = vmatmul.mubr.f32.vlgmr.msra.gmra.mrb[0].mxu1 %v3253_v1 }
  0x22   :  { %2903 = vmatpush3.bf16.msra.mxu1 %v3326_v37  ;;  %2644 = vmatprep.mubr.msk.f32.mxu1 %vm3252_vm0, %v3253_v1 }
  0x23   :  { %2904 = vmatprep.subr.bf16.mxu1 %v3251_v0 }
  0x24   :  { %2912 = vmatpush3.bf16.msra.mxu0 %v3320_v34 }
  0x25   :  { %2919 = vmatprep.subr.bf16.mxu0 %v3251_v0 }
  0x26   :  { %2906 = vmatpush3.bf16.msra.mxu1 %v3334_v41 }
  0x27   :  { %2913 = vmatprep.subr.bf16.mxu1 %v3251_v0 }
  0xea   :  { %v2613_v12 = vpop.f32.mrb[0].mxu0 }
  0xeb   :  { %v3307_v13 = vadd.f32 %v2613_v12, %v2437_v11  ;;  %v125_v14 = vpop.f32.mrb[1].mxu0 }
  0xec   :  { %v3309_v15 = vadd.f32 %v2437_v11, %v125_v14 }
  0xf2   :  { %v278_v16 = vpop.f32.mrb[2].mxu0 }
  0xf3   :  { %v282_v17 = vadd.f32 %v278_v16, %v3309_v15  ;;  %v2635_v18 = vpop.f32.mrb[3].mxu0 }
  0xf5   :  { %3072 = vtanh.f32 %v282_v17  ;;  %v2441_v20 = vmul.f32 -1.442695, %v282_v17 }
  0xf7   :  { %3074 = vpow2.f32 %v2441_v20 }
  0xff   :  { %v3073_v19 = vpop.eup %3072 }
 0x100   :  { %292 = vrot.lane.b32.xlu0 %v3073_v19, %s3254_s0 }
 0x101   :  { %v3075_v21 = vpop.eup %3074 }
 0x102   :  { %v286_v22 = vadd.f32 1.0, %v3075_v21 }
 0x104   :  { %3076 = vrcp.f32 %v286_v22 }
 0x10e   :  { %v3077_v23 = vpop.eup %3076 }
 0x10f   :  { %v290_v26 = vmul.f32 0.0, %v3077_v23 }
 0x172   :  { %v293_v24 = vpop.permute.xlu0 %292 }
 0x173   :  { %v295_v25 = vmul.f32 %v3077_v23, %v293_v24 }
 0x175   :  { %297 = vrot.lane.b32.xlu0 %v295_v25, %s3255_s1 }
 0x1e7   :  { %v298_v27 = vpop.permute.xlu0 %297 }
 0x1e8   :  { %v3314_v28 = vadd.f32 %v298_v27, %v290_v26 }
 0x1ea   :  { %3078 = vtanh.f32 %v3314_v28  ;;  %v564_v9 = vrot.slane %v3314_v28, 6 }
 0x1f4   :  { %v3079_v40 = vpop.eup %3078 }
 0x1f5   :  { %303 = vrot.lane.b32.xlu1 %v3079_v40, %s3254_s0 }
 0x267   :  { %v304_v42 = vpop.permute.xlu1 %303 }
 0x268   :  { %v306_v43 = vmul.f32 %v3077_v23, %v304_v42 }
 0x26a   :  { %308 = vrot.lane.b32.xlu1 %v306_v43, %s3255_s1 }
 0x2dc   :  { %v309_v44 = vpop.permute.xlu1 %308 }
 0x2dd   :  { %2645 = vmatmul.mubr.msk.f32.vlgmr.msra.gmra.mrb[0].mxu1 %vm138_vm2, %v309_v44 }
 0x2de   :  { %2915 = vmatpush3.bf16.msra.mxu1 %v3293_v8  ;;  %2666 = vmatprep.mubr.msk.f32.mxu1 %vm3252_vm0, %v3253_v1 }
 0x2df   :  { %2916 = vmatprep.subr.bf16.mxu1 %v3251_v0 }
 0x2e2   :  { %2918 = vmatpush3.bf16.msra.mxu1 %v3297_v10 }
 0x2e3   :  { %2925 = vmatprep.subr.bf16.mxu1 %v3251_v0 }
 0x2e5   :  { %2667 = vmatmul.mubr.msk.f32.vlgmr.msra.gmra.mrb[2].mxu1 %vm138_vm2, %v309_v44 }
 0x2e6   :  { %2927 = vmatpush3.bf16.msra.mxu1 %v3317_v32  ;;  %2688 = vmatprep.mubr.msk.f32.mxu1 %vm3252_vm0, %v3253_v1 }
 0x2e7   :  { %2928 = vmatprep.subr.bf16.mxu1 %v3251_v0 }
 0x2ea   :  { %2930 = vmatpush3.bf16.msra.mxu1 %v3320_v34 }
 0x2eb   :  { %2937 = vmatprep.subr.bf16.mxu1 %v3251_v0 }
 0x3b0   :  { %v378_v46 = vpop.f32.mrb[0].mxu1 }
 0x3b1   :  { %v3039_v47 = vadd.f32 %v3356_v45, %v378_v46  ;;  %v2646_v48 = vpop.f32.mrb[1].mxu1 }
 0x3b3   :  { %3080 = vtanh.f32 %v3039_v47  ;;  %v2443_v55 = vmul.f32 -1.442695, %v3039_v47 }
 0x3b8   :  { %v548_v49 = vpop.f32.mrb[2].mxu1 }
 0x3b9   :  { %v553_v50 = vrot.slane %v548_v49, 6  ;;  %v2668_v51 = vpop.f32.mrb[3].mxu1 }
 0x3bb   :  { %v555_v52 = vadd.f32 %v553_v50, %v3309_v15 }
 0x3bd   :  { %v3081_v53 = vpop.eup %3080  ;;  %3082 = vtanh.f32 %v555_v52  ;;  %v2446_v56 = vmul.f32 -1.442695, %v555_v52 }
 0x3be   :  { %392 = vrot.lane.b32.xlu0 %v3081_v53, %s3254_s0  ;;  %3084 = vpow2.f32 %v2443_v55 }
 0x3bf   :  { %3086 = vpow2.f32 %v2446_v56 }
 0x3c7   :  { %v3083_v54 = vpop.eup %3082 }
 0x3c8   :  { %568 = vrot.lane.b32.xlu1 %v3083_v54, %s3254_s0  ;;  %v3085_v57 = vpop.eup %3084 }
 0x3c9   :  { %v386_v58 = vadd.f32 1.0, %v3085_v57  ;;  %v3087_v59 = vpop.eup %3086 }
 0x3ca   :  { %v559_v60 = vadd.f32 1.0, %v3087_v59 }
 0x3cb   :  { %3088 = vrcp.f32 %v386_v58 }
 0x3cc   :  { %3090 = vrcp.f32 %v559_v60 }
 0x3d5   :  { %v3089_v61 = vpop.eup %3088 }
 0x3d6   :  { %v3091_v2 = vpop.eup %3090  ;;  %v390_v5 = vmul.f32 0.0, %v3089_v61 }
 0x3d7   :  { %v566_v11 = vmul.f32 %v3091_v2, %v564_v9 }
 0x430   :  { %v393_v62 = vpop.permute.xlu0 %392 }
 0x431   :  { %v395_v63 = vmul.f32 %v3089_v61, %v393_v62 }
 0x433   :  { %397 = vrot.lane.b32.xlu0 %v395_v63, %s3255_s1 }
 0x43a   :  { %v569_v3 = vpop.permute.xlu1 %568 }
 0x43b   :  { %v571_v4 = vmul.f32 %v3091_v2, %v569_v3 }
 0x43d   :  { %573 = vrot.lane.b32.xlu1 %v571_v4, %s3255_s1 }
 0x4a5   :  { %v398_v6 = vpop.permute.xlu0 %397 }
 0x4a6   :  { %v3364_v7 = vadd.f32 %v398_v6, %v390_v5 }
 0x4a8   :  { %3092 = vtanh.f32 %v3364_v7 }
 0x4af   :  { %v574_v12 = vpop.permute.xlu1 %573 }
 0x4b0   :  { %v3368_v14 = vadd.f32 %v574_v12, %v566_v11 }
 0x4b2   :  { %v3093_v16 = vpop.eup %3092  ;;  %3094 = vtanh.f32 %v3368_v14  ;;  %v841_v54 = vrot.slane %v3368_v14, 6 }
 0x4b3   :  { %403 = vrot.lane.b32.xlu0 %v3093_v16, %s3254_s0 }
 0x4bc   :  { %v3095_v17 = vpop.eup %3094 }
 0x4bd   :  { %579 = vrot.lane.b32.xlu1 %v3095_v17, %s3254_s0 }
 0x525   :  { %v404_v18 = vpop.permute.xlu0 %403 }
 0x526   :  { %v406_v19 = vmul.f32 %v3089_v61, %v404_v18 }
 0x528   :  { %408 = vrot.lane.b32.xlu0 %v406_v19, %s3255_s1 }
 0x52f   :  { %v580_v20 = vpop.permute.xlu1 %579 }
 0x530   :  { %v582_v21 = vmul.f32 %v3091_v2, %v580_v20 }
 0x532   :  { %v584_v22 = vrot.slane %v582_v21, 2 }
 0x534   :  { %585 = vrot.lane.b32.xlu1 %v584_v22, %s3255_s1 }
 0x59a   :  { %v409_v23 = vpop.permute.xlu0 %408 }
 0x59b   :  { %2656 = vmatmul.mubr.msk.f32.vlgmr.msra.gmra.mrb[4].mxu0 %vm138_vm2, %v409_v23 }
 0x59c   :  { %2921 = vmatpush3.bf16.msra.mxu0 %v3326_v37  ;;  %2677 = vmatprep.mubr.msk.f32.mxu0 %vm3252_vm0, %v3253_v1 }
 0x59d   :  { %2922 = vmatprep.subr.bf16.mxu0 %v3251_v0 }
 0x5a0   :  { %2924 = vmatpush3.bf16.msra.mxu0 %v3334_v41 }
 0x5a1   :  { %2931 = vmatprep.subr.bf16.mxu0 %v3251_v0 }
 0x5a6   :  { %v586_v24 = vpop.permute.xlu1 %585 }
 0x5a7   :  { %2678 = vmatmul.mubr.msk.f32.vlgmr.msra.gmra.mrb[4].mxu0 %vm138_vm2, %v586_v24 }
 0x5a8   :  { %2933 = vmatpush3.bf16.msra.mxu0 %v3293_v8  ;;  %2699 = vmatprep.mubr.msk.f32.mxu0 %vm3252_vm0, %v3253_v1 }
 0x5a9   :  { %2934 = vmatprep.subr.bf16.mxu0 %v3251_v0 }
 0x5ac   :  { %2936 = vmatpush3.bf16.msra.mxu0 %v3297_v10 }
 0x5ad   :  { %2943 = vmatprep.subr.bf16.mxu0 %v3251_v0 }
 0x5af   :  { %2700 = vmatmul.mubr.msk.f32.vlgmr.msra.gmra.mrb[6].mxu0 %vm138_vm2, %v586_v24 }
 0x5b0   :  { %2945 = vmatpush3.bf16.msra.mxu0 %v3317_v32  ;;  %2721 = vmatprep.mubr.msk.f32.mxu0 %vm3252_vm0, %v3253_v1 }
 0x5b1   :  { %2946 = vmatprep.subr.bf16.mxu0 %v3251_v0 }
 0x5b4   :  { %2948 = vmatpush3.bf16.msra.mxu0 %v3320_v34 }
 0x5b5   :  { %2955 = vmatprep.subr.bf16.mxu0 %v3251_v0 }
 0x67a   :  { %v655_v25 = vpop.f32.mrb[4].mxu0 }
 0x67b   :  { %v3040_v26 = vadd.f32 %v3356_v45, %v655_v25  ;;  %v2679_v27 = vpop.f32.mrb[5].mxu0 }
 0x67d   :  { %3096 = vtanh.f32 %v3040_v26  ;;  %v2448_v36 = vmul.f32 -1.442695, %v3040_v26 }
 0x682   :  { %v825_v28 = vpop.f32.mrb[6].mxu0 }
 0x683   :  { %v830_v29 = vrot.slane %v825_v28, 4  ;;  %v2701_v30 = vpop.f32.mrb[7].mxu0 }
 0x685   :  { %v832_v31 = vadd.f32 %v830_v29, %v3309_v15 }
 0x687   :  { %v3097_v33 = vpop.eup %3096  ;;  %3098 = vtanh.f32 %v832_v31  ;;  %v2451_v38 = vmul.f32 -1.442695, %v832_v31 }
 0x688   :  { %669 = vrot.lane.b32.xlu0 %v3097_v33, %s3254_s0  ;;  %3100 = vpow2.f32 %v2448_v36 }
 0x689   :  { %3102 = vpow2.f32 %v2451_v38 }
 0x691   :  { %v3099_v35 = vpop.eup %3098 }
 0x692   :  { %845 = vrot.lane.b32.xlu1 %v3099_v35, %s3254_s0  ;;  %v3101_v39 = vpop.eup %3100 }
 0x693   :  { %v663_v40 = vadd.f32 1.0, %v3101_v39  ;;  %v3103_v42 = vpop.eup %3102 }
 0x694   :  { %v836_v43 = vadd.f32 1.0, %v3103_v42 }
 0x695   :  { %3104 = vrcp.f32 %v663_v40 }
 0x696   :  { %3106 = vrcp.f32 %v836_v43 }
 0x69f   :  { %v3105_v44 = vpop.eup %3104 }
 0x6a0   :  { %v3107_v48 = vpop.eup %3106  ;;  %v667_v51 = vmul.f32 %v3105_v44, %v3364_v7 }
 0x6a1   :  { %v843_v55 = vmul.f32 %v3107_v48, %v841_v54 }
 0x6fa   :  { %v670_v46 = vpop.permute.xlu0 %669 }
 0x6fb   :  { %v672_v47 = vmul.f32 %v3105_v44, %v670_v46 }
 0x6fd   :  { %674 = vrot.lane.b32.xlu0 %v672_v47, %s3255_s1 }
 0x704   :  { %v846_v49 = vpop.permute.xlu1 %845 }
 0x705   :  { %v848_v50 = vmul.f32 %v3107_v48, %v846_v49 }
 0x707   :  { %850 = vrot.lane.b32.xlu1 %v848_v50, %s3255_s1 }
 0x76f   :  { %v675_v52 = vpop.permute.xlu0 %674 }
 0x770   :  { %v3403_v53 = vadd.f32 %v675_v52, %v667_v51 }
 0x772   :  { %3108 = vtanh.f32 %v3403_v53 }
 0x779   :  { %v851_v56 = vpop.permute.xlu1 %850 }
 0x77a   :  { %v3407_v57 = vadd.f32 %v851_v56, %v843_v55 }
 0x77c   :  { %v3109_v58 = vpop.eup %3108  ;;  %3110 = vtanh.f32 %v3407_v57  ;;  %v1118_v33 = vrot.slane %v3407_v57, 6 }
 0x77d   :  { %680 = vrot.lane.b32.xlu0 %v3109_v58, %s3254_s0 }
 0x786   :  { %v3111_v59 = vpop.eup %3110 }
 0x787   :  { %856 = vrot.lane.b32.xlu1 %v3111_v59, %s3254_s0 }
 0x7ef   :  { %v681_v60 = vpop.permute.xlu0 %680 }
 0x7f0   :  { %v683_v61 = vmul.f32 %v3105_v44, %v681_v60 }
 0x7f2   :  { %685 = vrot.lane.b32.xlu0 %v683_v61, %s3255_s1 }
 0x7f9   :  { %v857_v62 = vpop.permute.xlu1 %856 }
 0x7fa   :  { %v859_v63 = vmul.f32 %v3107_v48, %v857_v62 }
 0x7fc   :  { %v861_v2 = vrot.slane %v859_v63, 4 }
 0x7fe   :  { %862 = vrot.lane.b32.xlu1 %v861_v2, %s3255_s1 }
 0x864   :  { %v686_v3 = vpop.permute.xlu0 %685 }
 0x865   :  { %2689 = vmatmul.mubr.msk.f32.vlgmr.msra.gmra.mrb[4].mxu1 %vm138_vm2, %v686_v3 }
 0x866   :  { %2939 = vmatpush3.bf16.msra.mxu1 %v3326_v37  ;;  %2710 = vmatprep.mubr.msk.f32.mxu1 %vm3252_vm0, %v3253_v1 }
 0x867   :  { %2940 = vmatprep.subr.bf16.mxu1 %v3251_v0 }
 0x86a   :  { %2942 = vmatpush3.bf16.msra.mxu1 %v3334_v41 }
 0x86b   :  { %2949 = vmatprep.subr.bf16.mxu1 %v3251_v0 }
 0x870   :  { %v863_v4 = vpop.permute.xlu1 %862 }
 0x871   :  { %2711 = vmatmul.mubr.msk.f32.vlgmr.msra.gmra.mrb[4].mxu1 %vm138_vm2, %v863_v4 }
 0x872   :  { %2951 = vmatpush3.bf16.msra.mxu1 %v3293_v8  ;;  %2732 = vmatprep.mubr.msk.f32.mxu1 %vm3252_vm0, %v3253_v1 }
 0x873   :  { %2952 = vmatprep.subr.bf16.mxu1 %v3251_v0 }
 0x876   :  { %2954 = vmatpush3.bf16.msra.mxu1 %v3297_v10 }
 0x877   :  { %2961 = vmatprep.subr.bf16.mxu1 %v3251_v0 }
 0x879   :  { %2733 = vmatmul.mubr.msk.f32.vlgmr.msra.gmra.mrb[6].mxu1 %vm138_vm2, %v863_v4 }
 0x87a   :  { %2963 = vmatpush3.bf16.msra.mxu1 %v3317_v32  ;;  %2754 = vmatprep.mubr.msk.f32.mxu1 %vm3252_vm0, %v3253_v1 }
 0x87b   :  { %2964 = vmatprep.subr.bf16.mxu1 %v3251_v0 }
 0x87e   :  { %2966 = vmatpush3.bf16.msra.mxu1 %v3320_v34 }
 0x87f   :  { %2973 = vmatprep.subr.bf16.mxu1 %v3251_v0 }
 0x944   :  { %v932_v5 = vpop.f32.mrb[4].mxu1 }
 0x945   :  { %v3041_v6 = vadd.f32 %v3356_v45, %v932_v5  ;;  %v2712_v7 = vpop.f32.mrb[5].mxu1 }
 0x947   :  { %3112 = vtanh.f32 %v3041_v6  ;;  %v2453_v18 = vmul.f32 -1.442695, %v3041_v6 }
 0x94c   :  { %v1102_v9 = vpop.f32.mrb[6].mxu1 }
 0x94d   :  { %v1107_v11 = vrot.slane %v1102_v9, 2  ;;  %v2734_v12 = vpop.f32.mrb[7].mxu1 }
 0x94f   :  { %v1109_v14 = vadd.f32 %v1107_v11, %v3309_v15 }
 0x951   :  { %v3113_v16 = vpop.eup %3112  ;;  %3114 = vtanh.f32 %v1109_v14  ;;  %v2456_v19 = vmul.f32 -1.442695, %v1109_v14 }
 0x952   :  { %946 = vrot.lane.b32.xlu0 %v3113_v16, %s3254_s0  ;;  %3116 = vpow2.f32 %v2453_v18 }
 0x953   :  { %3118 = vpow2.f32 %v2456_v19 }
 0x95b   :  { %v3115_v17 = vpop.eup %3114 }
 0x95c   :  { %1122 = vrot.lane.b32.xlu1 %v3115_v17, %s3254_s0  ;;  %v3117_v20 = vpop.eup %3116 }
 0x95d   :  { %v940_v21 = vadd.f32 1.0, %v3117_v20  ;;  %v3119_v22 = vpop.eup %3118 }
 0x95e   :  { %v1113_v23 = vadd.f32 1.0, %v3119_v22 }
 0x95f   :  { %3120 = vrcp.f32 %v940_v21 }
 0x960   :  { %3122 = vrcp.f32 %v1113_v23 }
 0x969   :  { %v3121_v24 = vpop.eup %3120 }
 0x96a   :  { %v3123_v26 = vpop.eup %3122  ;;  %v944_v29 = vmul.f32 %v3121_v24, %v3403_v53 }
 0x96b   :  { %v1120_v35 = vmul.f32 %v3123_v26, %v1118_v33 }
 0x9c4   :  { %v947_v25 = vpop.permute.xlu0 %946 }
 0x9c5   :  { %v949_v15 = vmul.f32 %v3121_v24, %v947_v25 }
 0x9c7   :  { %951 = vrot.lane.b32.xlu0 %v949_v15, %s3255_s1 }
 0x9ce   :  { %v1123_v27 = vpop.permute.xlu1 %1122 }
 0x9cf   :  { %v1125_v28 = vmul.f32 %v3123_v26, %v1123_v27 }
 0x9d1   :  { %1127 = vrot.lane.b32.xlu1 %v1125_v28, %s3255_s1 }
 0xa39   :  { %v952_v30 = vpop.permute.xlu0 %951 }
 0xa3a   :  { %v3442_v31 = vadd.f32 %v952_v30, %v944_v29 }
 0xa3c   :  { %3124 = vtanh.f32 %v3442_v31 }
 0xa43   :  { %v1128_v36 = vpop.permute.xlu1 %1127 }
 0xa44   :  { %v3446_v38 = vadd.f32 %v1128_v36, %v1120_v35 }
 0xa46   :  { %v3125_v39 = vpop.eup %3124  ;;  %3126 = vtanh.f32 %v3446_v38  ;;  %v1392_v14 = vrot.slane %v3446_v38, 6 }
 0xa47   :  { %957 = vrot.lane.b32.xlu0 %v3125_v39, %s3254_s0 }
 0xa50   :  { %v3127_v40 = vpop.eup %3126 }
 0xa51   :  { %1133 = vrot.lane.b32.xlu1 %v3127_v40, %s3254_s0 }
 0xab9   :  { %v958_v42 = vpop.permute.xlu0 %957 }
 0xaba   :  { %v960_v43 = vmul.f32 %v3121_v24, %v958_v42 }
 0xabc   :  { %962 = vrot.lane.b32.xlu0 %v960_v43, %s3255_s1 }
 0xac3   :  { %v1134_v44 = vpop.permute.xlu1 %1133 }
 0xac4   :  { %v1136_v46 = vmul.f32 %v3123_v26, %v1134_v44 }
 0xac6   :  { %v1138_v47 = vrot.slane %v1136_v46, 6 }
 0xac8   :  { %1139 = vrot.lane.b32.xlu1 %v1138_v47, %s3255_s1 }
 0xb2e   :  { %v963_v48 = vpop.permute.xlu0 %962 }
 0xb2f   :  { %2722 = vmatmul.mubr.msk.f32.vlgmr.msra.gmra.mrb[8].mxu0 %vm138_vm2, %v963_v48 }
 0xb30   :  { %2957 = vmatpush3.bf16.msra.mxu0 %v3326_v37  ;;  %2743 = vmatprep.mubr.msk.f32.mxu0 %vm3252_vm0, %v3253_v1 }
 0xb31   :  { %2958 = vmatprep.subr.bf16.mxu0 %v3251_v0 }
 0xb34   :  { %2960 = vmatpush3.bf16.msra.mxu0 %v3334_v41 }
 0xb35   :  { %2967 = vmatprep.subr.bf16.mxu0 %v3251_v0 }
 0xb3a   :  { %v1140_v49 = vpop.permute.xlu1 %1139 }
 0xb3b   :  { %2744 = vmatmul.mubr.msk.f32.vlgmr.msra.gmra.mrb[8].mxu0 %vm138_vm2, %v1140_v49 }
 0xb3c   :  { %2969 = vmatpush3.bf16.msra.mxu0 %v3293_v8  ;;  %2765 = vmatprep.mubr.msk.f32.mxu0 %vm3252_vm0, %v3253_v1 }
 0xb3d   :  { %2970 = vmatprep.subr.bf16.mxu0 %v3251_v0 }
 0xb40   :  { %2972 = vmatpush3.bf16.msra.mxu0 %v3297_v10 }
 0xb41   :  { %2979 = vmatprep.subr.bf16.mxu0 %v3251_v0 }
 0xb43   :  { %2766 = vmatmul.mubr.msk.f32.vlgmr.msra.gmra.mrb[10].mxu0 %vm138_vm2, %v1140_v49 }
 0xb44   :  { %2981 = vmatpush3.bf16.msra.mxu0 %v3317_v32  ;;  %2787 = vmatprep.mubr.msk.f32.mxu0 %vm3252_vm0, %v3253_v1 }
 0xb45   :  { %2982 = vmatprep.subr.bf16.mxu0 %v3251_v0 }
 0xb48   :  { %2984 = vmatpush3.bf16.msra.mxu0 %v3320_v34 }
 0xb49   :  { %2991 = vmatprep.subr.bf16.mxu0 %v3251_v0 }
 0xc0e   :  { %v1209_v50 = vpop.f32.mrb[8].mxu0 }
 0xc0f   :  { %v3042_v51 = vadd.f32 %v3356_v45, %v1209_v50  ;;  %v2745_v52 = vpop.f32.mrb[9].mxu0 }
 0xc11   :  { %3128 = vtanh.f32 %v3042_v51  ;;  %v2458_v58 = vmul.f32 -1.442695, %v3042_v51 }
 0xc16   :  { %v1379_v53 = vpop.f32.mrb[10].mxu0 }
 0xc17   :  { %v1383_v54 = vadd.f32 %v1379_v53, %v3307_v13  ;;  %v2767_v55 = vpop.f32.mrb[11].mxu0 }
 0xc19   :  { %3130 = vtanh.f32 %v1383_v54  ;;  %v2461_v59 = vmul.f32 -1.442695, %v1383_v54 }
 0xc1a   :  { %3132 = vpow2.f32 %v2458_v58 }
 0xc1b   :  { %v3129_v56 = vpop.eup %3128  ;;  %3134 = vpow2.f32 %v2461_v59 }
 0xc1c   :  { %1223 = vrot.lane.b32.xlu0 %v3129_v56, %s3254_s0 }
 0xc23   :  { %v3131_v57 = vpop.eup %3130 }
 0xc24   :  { %1396 = vrot.lane.b32.xlu1 %v3131_v57, %s3254_s0  ;;  %v3133_v60 = vpop.eup %3132 }
 0xc25   :  { %v1217_v61 = vadd.f32 1.0, %v3133_v60  ;;  %v3135_v62 = vpop.eup %3134 }
 0xc26   :  { %v1387_v63 = vadd.f32 1.0, %v3135_v62 }
 0xc27   :  { %3136 = vrcp.f32 %v1217_v61 }
 0xc28   :  { %3138 = vrcp.f32 %v1387_v63 }
 0xc31   :  { %v3137_v2 = vpop.eup %3136 }
 0xc32   :  { %v3139_v5 = vpop.eup %3138  ;;  %v1221_v9 = vmul.f32 %v3137_v2, %v3442_v31 }
 0xc33   :  { %v1394_v16 = vmul.f32 %v3139_v5, %v1392_v14 }
 0xc8e   :  { %v1224_v3 = vpop.permute.xlu0 %1223 }
 0xc8f   :  { %v1226_v4 = vmul.f32 %v3137_v2, %v1224_v3 }
 0xc91   :  { %1228 = vrot.lane.b32.xlu0 %v1226_v4, %s3255_s1 }
 0xc96   :  { %v1397_v6 = vpop.permute.xlu1 %1396 }
 0xc97   :  { %v1399_v7 = vmul.f32 %v3139_v5, %v1397_v6 }
 0xc99   :  { %1401 = vrot.lane.b32.xlu1 %v1399_v7, %s3255_s1 }
 0xd03   :  { %v1229_v11 = vpop.permute.xlu0 %1228 }
 0xd04   :  { %v3481_v12 = vadd.f32 %v1229_v11, %v1221_v9 }
 0xd06   :  { %3140 = vtanh.f32 %v3481_v12 }
 0xd0b   :  { %v1402_v17 = vpop.permute.xlu1 %1401 }
 0xd0c   :  { %v3485_v18 = vadd.f32 %v1402_v17, %v1394_v16 }
 0xd0e   :  { %3142 = vtanh.f32 %v3485_v18  ;;  %v1668_v55 = vrot.slane %v3485_v18, 6 }
 0xd10   :  { %v3141_v19 = vpop.eup %3140 }
 0xd11   :  { %1234 = vrot.lane.b32.xlu0 %v3141_v19, %s3254_s0 }
 0xd18   :  { %v3143_v20 = vpop.eup %3142 }
 0xd19   :  { %1407 = vrot.lane.b32.xlu1 %v3143_v20, %s3254_s0 }
 0xd83   :  { %v1235_v21 = vpop.permute.xlu0 %1234 }
 0xd84   :  { %v1237_v22 = vmul.f32 %v3137_v2, %v1235_v21 }
 0xd86   :  { %1239 = vrot.lane.b32.xlu0 %v1237_v22, %s3255_s1 }
 0xd8b   :  { %v1408_v23 = vpop.permute.xlu1 %1407 }
 0xd8c   :  { %v1410_v24 = vmul.f32 %v3139_v5, %v1408_v23 }
 0xd8e   :  { %1412 = vrot.lane.b32.xlu1 %v1410_v24, %s3255_s1 }
 0xdf8   :  { %v1240_v25 = vpop.permute.xlu0 %1239 }
 0xdf9   :  { %2755 = vmatmul.mubr.msk.f32.vlgmr.msra.gmra.mrb[8].mxu1 %vm138_vm2, %v1240_v25 }
 0xdfa   :  { %2975 = vmatpush3.bf16.msra.mxu1 %v3326_v37  ;;  %2776 = vmatprep.mubr.msk.f32.mxu1 %vm3252_vm0, %v3253_v1 }
 0xdfb   :  { %2976 = vmatprep.subr.bf16.mxu1 %v3251_v0 }
 0xdfe   :  { %2978 = vmatpush3.bf16.msra.mxu1 %v3334_v41 }
 0xdff   :  { %2985 = vmatprep.subr.bf16.mxu1 %v3251_v0 }
 0xe00   :  { %v1413_v15 = vpop.permute.xlu1 %1412 }
 0xe01   :  { %2777 = vmatmul.mubr.msk.f32.vlgmr.msra.gmra.mrb[8].mxu1 %vm138_vm2, %v1413_v15 }
 0xe02   :  { %2987 = vmatpush3.bf16.msra.mxu1 %v3293_v8  ;;  %2798 = vmatprep.mubr.msk.f32.mxu1 %vm3252_vm0, %v3253_v1 }
 0xe03   :  { %2988 = vmatprep.subr.bf16.mxu1 %v3251_v0 }
 0xe06   :  { %2990 = vmatpush3.bf16.msra.mxu1 %v3297_v10 }
 0xe07   :  { %2997 = vmatprep.subr.bf16.mxu1 %v3251_v0 }
 0xe09   :  { %2799 = vmatmul.mubr.msk.f32.vlgmr.msra.gmra.mrb[10].mxu1 %vm138_vm2, %v1413_v15 }
 0xe0a   :  { %2999 = vmatpush3.bf16.msra.mxu1 %v3317_v32  ;;  %2820 = vmatprep.mubr.msk.f32.mxu1 %vm3252_vm0, %v3253_v1 }
 0xe0b   :  { %3000 = vmatprep.subr.bf16.mxu1 %v3251_v0 }
 0xe0e   :  { %3002 = vmatpush3.bf16.msra.mxu1 %v3320_v34 }
 0xe0f   :  { %3009 = vmatprep.subr.bf16.mxu1 %v3251_v0 }
 0xed4   :  { %v1482_v26 = vpop.f32.mrb[8].mxu1 }
 0xed5   :  { %v3043_v27 = vadd.f32 %v3356_v45, %v1482_v26  ;;  %v2778_v28 = vpop.f32.mrb[9].mxu1 }
 0xed7   :  { %3144 = vtanh.f32 %v3043_v27  ;;  %v2463_v38 = vmul.f32 -1.442695, %v3043_v27 }
 0xedc   :  { %v1652_v29 = vpop.f32.mrb[10].mxu1 }
 0xedd   :  { %v1657_v30 = vrot.slane %v1652_v29, 6  ;;  %v2800_v31 = vpop.f32.mrb[11].mxu1 }
 0xedf   :  { %v1659_v33 = vadd.f32 %v1657_v30, %v3307_v13 }
 0xee1   :  { %v3145_v35 = vpop.eup %3144  ;;  %3146 = vtanh.f32 %v1659_v33  ;;  %v2466_v39 = vmul.f32 -1.442695, %v1659_v33 }
 0xee2   :  { %1496 = vrot.lane.b32.xlu0 %v3145_v35, %s3254_s0  ;;  %3148 = vpow2.f32 %v2463_v38 }
 0xee3   :  { %3150 = vpow2.f32 %v2466_v39 }
 0xeeb   :  { %v3147_v36 = vpop.eup %3146 }
 0xeec   :  { %1672 = vrot.lane.b32.xlu1 %v3147_v36, %s3254_s0  ;;  %v3149_v40 = vpop.eup %3148 }
 0xeed   :  { %v1490_v42 = vadd.f32 1.0, %v3149_v40  ;;  %v3151_v43 = vpop.eup %3150 }
 0xeee   :  { %v1663_v44 = vadd.f32 1.0, %v3151_v43 }
 0xeef   :  { %3152 = vrcp.f32 %v1490_v42 }
 0xef0   :  { %3154 = vrcp.f32 %v1663_v44 }
 0xef9   :  { %v3153_v46 = vpop.eup %3152 }
 0xefa   :  { %v3155_v49 = vpop.eup %3154  ;;  %v1494_v52 = vmul.f32 %v3153_v46, %v3481_v12 }
 0xefb   :  { %v1670_v56 = vmul.f32 %v3155_v49, %v1668_v55 }
 0xf54   :  { %v1497_v47 = vpop.permute.xlu0 %1496 }
 0xf55   :  { %v1499_v48 = vmul.f32 %v3153_v46, %v1497_v47 }
 0xf57   :  { %1501 = vrot.lane.b32.xlu0 %v1499_v48, %s3255_s1 }
 0xf5e   :  { %v1673_v50 = vpop.permute.xlu1 %1672 }
 0xf5f   :  { %v1675_v51 = vmul.f32 %v3155_v49, %v1673_v50 }
 0xf61   :  { %1677 = vrot.lane.b32.xlu1 %v1675_v51, %s3255_s1 }
 0xfc9   :  { %v1502_v53 = vpop.permute.xlu0 %1501 }
 0xfca   :  { %v3520_v54 = vadd.f32 %v1502_v53, %v1494_v52 }
 0xfcc   :  { %3156 = vtanh.f32 %v3520_v54 }
 0xfd3   :  { %v1678_v57 = vpop.permute.xlu1 %1677 }
 0xfd4   :  { %v3524_v58 = vadd.f32 %v1678_v57, %v1670_v56 }
 0xfd6   :  { %v3157_v59 = vpop.eup %3156  ;;  %3158 = vtanh.f32 %v3524_v58  ;;  %v1945_v31 = vrot.slane %v3524_v58, 6 }
 0xfd7   :  { %1507 = vrot.lane.b32.xlu0 %v3157_v59, %s3254_s0 }
 0xfe0   :  { %v3159_v60 = vpop.eup %3158 }
 0xfe1   :  { %1683 = vrot.lane.b32.xlu1 %v3159_v60, %s3254_s0 }
0x1049   :  { %v1508_v61 = vpop.permute.xlu0 %1507 }
0x104a   :  { %v1510_v62 = vmul.f32 %v3153_v46, %v1508_v61 }
0x104c   :  { %1512 = vrot.lane.b32.xlu0 %v1510_v62, %s3255_s1 }
0x1053   :  { %v1684_v63 = vpop.permute.xlu1 %1683 }
0x1054   :  { %v1686_v2 = vmul.f32 %v3155_v49, %v1684_v63 }
0x1056   :  { %v1688_v3 = vrot.slane %v1686_v2, 2 }
0x1058   :  { %1689 = vrot.lane.b32.xlu1 %v1688_v3, %s3255_s1 }
0x10be   :  { %v1513_v4 = vpop.permute.xlu0 %1512 }
0x10bf   :  { %2788 = vmatmul.mubr.msk.f32.vlgmr.msra.gmra.mrb[12].mxu0 %vm138_vm2, %v1513_v4 }
0x10c0   :  { %2993 = vmatpush3.bf16.msra.mxu0 %v3326_v37  ;;  %2809 = vmatprep.mubr.msk.f32.mxu0 %vm3252_vm0, %v3253_v1 }
0x10c1   :  { %2994 = vmatprep.subr.bf16.mxu0 %v3251_v0 }
0x10c4   :  { %2996 = vmatpush3.bf16.msra.mxu0 %v3334_v41 }
0x10c5   :  { %3003 = vmatprep.subr.bf16.mxu0 %v3251_v0 }
0x10ca   :  { %v1690_v5 = vpop.permute.xlu1 %1689 }
0x10cb   :  { %2810 = vmatmul.mubr.msk.f32.vlgmr.msra.gmra.mrb[12].mxu0 %vm138_vm2, %v1690_v5 }
0x10cc   :  { %3005 = vmatpush3.bf16.msra.mxu0 %v3293_v8  ;;  %2831 = vmatprep.mubr.msk.f32.mxu0 %vm3252_vm0, %v3253_v1 }
0x10cd   :  { %3006 = vmatprep.subr.bf16.mxu0 %v3251_v0 }
0x10d0   :  { %3008 = vmatpush3.bf16.msra.mxu0 %v3297_v10 }
0x10d1   :  { %3015 = vmatprep.subr.bf16.mxu0 %v3251_v0 }
0x10d3   :  { %2832 = vmatmul.mubr.msk.f32.vlgmr.msra.gmra.mrb[14].mxu0 %vm138_vm2, %v1690_v5 }
0x10d4   :  { %3017 = vmatpush3.bf16.msra.mxu0 %v3317_v32  ;;  %2853 = vmatprep.mubr.msk.f32.mxu0 %vm3252_vm0, %v3253_v1 }
0x10d5   :  { %3018 = vmatprep.subr.bf16.mxu0 %v3251_v0 }
0x10d8   :  { %3020 = vmatpush3.bf16.msra.mxu0 %v3320_v34 }
0x10d9   :  { %3027 = vmatprep.subr.bf16.mxu0 %v3251_v0 }
0x119e   :  { %v1759_v6 = vpop.f32.mrb[12].mxu0 }
0x119f   :  { %v3044_v7 = vadd.f32 %v3356_v45, %v1759_v6  ;;  %v2811_v9 = vpop.f32.mrb[13].mxu0 }
0x11a1   :  { %3160 = vtanh.f32 %v3044_v7  ;;  %v2468_v34 = vmul.f32 -1.442695, %v3044_v7 }
0x11a6   :  { %v1929_v11 = vpop.f32.mrb[14].mxu0 }
0x11a7   :  { %v1934_v12 = vrot.slane %v1929_v11, 4  ;;  %v2833_v14 = vpop.f32.mrb[15].mxu0 }
0x11a9   :  { %v1936_v16 = vadd.f32 %v1934_v12, %v3307_v13 }
0x11ab   :  { %v3161_v32 = vpop.eup %3160  ;;  %3162 = vtanh.f32 %v1936_v16  ;;  %v2471_v18 = vmul.f32 -1.442695, %v1936_v16 }
0x11ac   :  { %1773 = vrot.lane.b32.xlu0 %v3161_v32, %s3254_s0  ;;  %3164 = vpow2.f32 %v2468_v34 }
0x11ad   :  { %3166 = vpow2.f32 %v2471_v18 }
0x11b5   :  { %v3163_v17 = vpop.eup %3162 }
0x11b6   :  { %1949 = vrot.lane.b32.xlu1 %v3163_v17, %s3254_s0  ;;  %v3165_v19 = vpop.eup %3164 }
0x11b7   :  { %v1767_v20 = vadd.f32 1.0, %v3165_v19  ;;  %v3167_v21 = vpop.eup %3166 }
0x11b8   :  { %v1940_v22 = vadd.f32 1.0, %v3167_v21 }
0x11b9   :  { %3168 = vrcp.f32 %v1767_v20 }
0x11ba   :  { %3170 = vrcp.f32 %v1940_v22 }
0x11c3   :  { %v3169_v23 = vpop.eup %3168 }
0x11c4   :  { %v3171_v15 = vpop.eup %3170  ;;  %v1771_v28 = vmul.f32 %v3169_v23, %v3520_v54 }
0x11c5   :  { %v1947_v33 = vmul.f32 %v3171_v15, %v1945_v31 }
0x121e   :  { %v1774_v24 = vpop.permute.xlu0 %1773 }
0x121f   :  { %v1776_v25 = vmul.f32 %v3169_v23, %v1774_v24 }
0x1221   :  { %1778 = vrot.lane.b32.xlu0 %v1776_v25, %s3255_s1 }
0x1228   :  { %v1950_v26 = vpop.permute.xlu1 %1949 }
0x1229   :  { %v1952_v27 = vmul.f32 %v3171_v15, %v1950_v26 }
0x122b   :  { %1954 = vrot.lane.b32.xlu1 %v1952_v27, %s3255_s1 }
0x1293   :  { %v1779_v29 = vpop.permute.xlu0 %1778 }
0x1294   :  { %v3559_v30 = vadd.f32 %v1779_v29, %v1771_v28 }
0x1296   :  { %3172 = vtanh.f32 %v3559_v30 }
0x129d   :  { %v1955_v35 = vpop.permute.xlu1 %1954 }
0x129e   :  { %v3563_v36 = vadd.f32 %v1955_v35, %v1947_v33  ;;  %v42_v33 = vld [vmem:[#allocation2 + $0x80] sm:$0xff]  ;;  %v43_v35 = vld [vmem:[#allocation2 + $0x88] sm:$0xff] }
0x12a0   :  { %v3173_v38 = vpop.eup %3172  ;;  %3174 = vtanh.f32 %v3563_v36  ;;  %v2222_v9 = vrot.slane %v3563_v36, 6 }
0x12a1   :  { %1784 = vrot.lane.b32.xlu0 %v3173_v38, %s3254_s0  ;;  %v44_v38 = vld [vmem:[#allocation2 + $0x90] sm:$0xff] }
0x12aa   :  { %v3175_v39 = vpop.eup %3174 }
0x12ab   :  { %1960 = vrot.lane.b32.xlu1 %v3175_v39, %s3254_s0  ;;  %v3037_v39 = vpack.c.bf16 %v44_v38, %v43_v35 }
0x1313   :  { %v1785_v40 = vpop.permute.xlu0 %1784 }
0x1314   :  { %v1787_v42 = vmul.f32 %v3169_v23, %v1785_v40 }
0x1316   :  { %1789 = vrot.lane.b32.xlu0 %v1787_v42, %s3255_s1 }
0x131d   :  { %v1961_v43 = vpop.permute.xlu1 %1960 }
0x131e   :  { %v1963_v44 = vmul.f32 %v3171_v15, %v1961_v43 }
0x1320   :  { %v1965_v46 = vrot.slane %v1963_v44, 4 }
0x1322   :  { %1966 = vrot.lane.b32.xlu1 %v1965_v46, %s3255_s1  ;;  %v2479_v46 = vld [vmem:[#allocation2 + $0x98] ss:$0 sm:$0xff] }
0x1388   :  { %v1790_v47 = vpop.permute.xlu0 %1789 }
0x1389   :  { %2821 = vmatmul.mubr.msk.f32.vlgmr.msra.gmra.mrb[12].mxu1 %vm138_vm2, %v1790_v47 }
0x138a   :  { %3011 = vmatpush3.bf16.msra.mxu1 %v3326_v37  ;;  %2842 = vmatprep.mubr.msk.f32.mxu1 %vm3252_vm0, %v3253_v1 }
0x138b   :  { %3012 = vmatprep.subr.bf16.mxu1 %v3251_v0 }
0x138e   :  { %3014 = vmatpush3.bf16.msra.mxu1 %v3334_v41 }
0x138f   :  { %3021 = vmatprep.subr.bf16.mxu1 %v3251_v0 }
0x1394   :  { %v1967_v48 = vpop.permute.xlu1 %1966 }
0x1395   :  { %2843 = vmatmul.mubr.msk.f32.vlgmr.msra.gmra.mrb[12].mxu1 %vm138_vm2, %v1967_v48 }
0x1396   :  { %3023 = vmatpush3.bf16.msra.mxu1 %v3293_v8  ;;  %2864 = vmatprep.mubr.msk.f32.mxu1 %vm3252_vm0, %v3253_v1 }
0x1397   :  { %3024 = vmatprep.subr.bf16.mxu1 %v3251_v0 }
0x139a   :  { %3026 = vmatpush3.bf16.msra.mxu1 %v3297_v10 }
0x139b   :  { %3033 = vmatprep.subr.bf16.mxu1 %v3251_v0 }
0x139d   :  { %2865 = vmatmul.mubr.msk.f32.vlgmr.msra.gmra.mrb[14].mxu1 %vm138_vm2, %v1967_v48 }
0x139e   :  { %2886 = vmatprep.mubr.msk.f32.mxu1 %vm3252_vm0, %v3253_v1 }
0x1468   :  { %v2036_v49 = vpop.f32.mrb[12].mxu1 }
0x1469   :  { %v3045_v50 = vadd.f32 %v3356_v45, %v2036_v49  ;;  %v2844_v51 = vpop.f32.mrb[13].mxu1 }
0x146b   :  { %3176 = vtanh.f32 %v3045_v50  ;;  %v2473_v56 = vmul.f32 -1.442695, %v3045_v50 }
0x1470   :  { %v2206_v8 = vpop.f32.mrb[14].mxu1 }
0x1471   :  { %v2211_v52 = vrot.slane %v2206_v8, 2  ;;  %v2866_v53 = vpop.f32.mrb[15].mxu1 }
0x1473   :  { %v2213_v54 = vadd.f32 %v2211_v52, %v3307_v13 }
0x1475   :  { %v3177_v55 = vpop.eup %3176  ;;  %3178 = vtanh.f32 %v2213_v54  ;;  %v2476_v57 = vmul.f32 -1.442695, %v2213_v54 }
0x1476   :  { %2050 = vrot.lane.b32.xlu0 %v3177_v55, %s3254_s0  ;;  %3180 = vpow2.f32 %v2473_v56 }
0x1477   :  { %3182 = vpow2.f32 %v2476_v57 }
0x147f   :  { %v3179_v10 = vpop.eup %3178 }
0x1480   :  { %2226 = vrot.lane.b32.xlu1 %v3179_v10, %s3254_s0  ;;  %v3181_v58 = vpop.eup %3180 }
0x1481   :  { %v2044_v59 = vadd.f32 1.0, %v3181_v58  ;;  %v3183_v60 = vpop.eup %3182 }
0x1482   :  { %v2217_v61 = vadd.f32 1.0, %v3183_v60 }
0x1483   :  { %3184 = vrcp.f32 %v2044_v59 }
0x1484   :  { %3186 = vrcp.f32 %v2217_v61 }
0x148d   :  { %v3185_v62 = vpop.eup %3184 }
0x148e   :  { %v3187_v2 = vpop.eup %3186  ;;  %v2048_v5 = vmul.f32 %v3185_v62, %v3559_v30 }
0x148f   :  { %v2224_v11 = vmul.f32 %v3187_v2, %v2222_v9 }
0x14e8   :  { %v2051_v63 = vpop.permute.xlu0 %2050 }
0x14e9   :  { %v2053_v13 = vmul.f32 %v3185_v62, %v2051_v63 }
0x14eb   :  { %2055 = vrot.lane.b32.xlu0 %v2053_v13, %s3255_s1 }
0x14f2   :  { %v2227_v3 = vpop.permute.xlu1 %2226 }
0x14f3   :  { %v2229_v4 = vmul.f32 %v3187_v2, %v2227_v3 }
0x14f5   :  { %2231 = vrot.lane.b32.xlu1 %v2229_v4, %s3255_s1 }
0x155d   :  { %v2056_v6 = vpop.permute.xlu0 %2055 }
0x155e   :  { %v2058_v7 = vadd.f32 %v2056_v6, %v2048_v5 }
0x1560   :  { %3188 = vtanh.f32 %v2058_v7 }
0x1567   :  { %v2232_v12 = vpop.permute.xlu1 %2231 }
0x1568   :  { %v2234_v14 = vadd.f32 %v2232_v12, %v2224_v11 }
0x156a   :  { %v3189_v16 = vpop.eup %3188  ;;  %3190 = vtanh.f32 %v2234_v14 }
0x156b   :  { %2061 = vrot.lane.b32.xlu0 %v3189_v16, %s3254_s0 }
0x1574   :  { %v3191_v32 = vpop.eup %3190 }
0x1575   :  { %2237 = vrot.lane.b32.xlu1 %v3191_v32, %s3254_s0 }
0x15dd   :  { %v2062_v17 = vpop.permute.xlu0 %2061 }
0x15de   :  { %v2064_v34 = vmul.f32 %v3185_v62, %v2062_v17 }
0x15e0   :  { %2066 = vrot.lane.b32.xlu0 %v2064_v34, %s3255_s1 }
0x15e7   :  { %v2238_v18 = vpop.permute.xlu1 %2237 }
0x15e8   :  { %v2240_v19 = vmul.f32 %v3187_v2, %v2238_v18 }
0x15ea   :  { %v2242_v20 = vrot.slane %v2240_v19, 6 }
0x15ec   :  { %2243 = vrot.lane.b32.xlu1 %v2242_v20, %s3255_s1 }
0x1652   :  { %v2067_v21 = vpop.permute.xlu0 %2066 }
0x1653   :  { %2854 = vmatmul.mubr.msk.f32.vlgmr.msra.gmra.mrb[16].mxu0 %vm138_vm2, %v2067_v21 }
0x1654   :  { %3029 = vmatpush3.bf16.msra.mxu0 %v3326_v37  ;;  %2875 = vmatprep.mubr.msk.f32.mxu0 %vm3252_vm0, %v3253_v1 }
0x1655   :  { %3030 = vmatprep.subr.bf16.mxu0 %v3251_v0 }
0x1658   :  { %3032 = vmatpush3.bf16.msra.mxu0 %v3334_v41 }
0x165e   :  { %v2244_v22 = vpop.permute.xlu1 %2243 }
0x165f   :  { %2876 = vmatmul.mubr.msk.f32.vlgmr.msra.gmra.mrb[16].mxu0 %vm138_vm2, %v2244_v22 }
0x1732   :  { %v2313_v23 = vpop.f32.mrb[16].mxu0 }
0x1733   :  { %v3046_v24 = vadd.f32 %v3356_v45, %v2313_v23  ;;  %v2877_v25 = vpop.f32.mrb[17].mxu0  ;;  %v41_v45 = vld [vmem:[#allocation2 + $0x78] sm:$0xff] }
0x1734   :  { %v3034_v36 = vpack.c.bf16 %v42_v33, %v41_v45 }
0x1735   :  { %3192 = vtanh.f32 %v3046_v24  ;;  %v2478_v26 = vmul.f32 -1.442695, %v3046_v24 }
0x1736   :  { %3035 = vmatpush3.bf16.msra.mxu1 %v3034_v36 }
0x1737   :  { %3194 = vpow2.f32 %v2478_v26  ;;  %3036 = vmatprep.subr.bf16.mxu1 %v3251_v0 }
0x173a   :  { %3038 = vmatpush3.bf16.msra.mxu1 %v3037_v39 }
0x173f   :  { %v3193_v15 = vpop.eup %3192 }
0x1740   :  { %2327 = vrot.lane.b32.xlu0 %v3193_v15, %s3254_s0 }
0x1741   :  { %v3195_v37 = vpop.eup %3194 }
0x1742   :  { %v2321_v27 = vadd.f32 1.0, %v3195_v37 }
0x1744   :  { %3196 = vrcp.f32 %v2321_v27 }
0x174e   :  { %v3197_v1 = vpop.eup %3196 }
0x174f   :  { %v2325_v41 = vmul.f32 %v3197_v1, %v2058_v7 }
0x17b2   :  { %v2328_v28 = vpop.permute.xlu0 %2327 }
0x17b3   :  { %v2330_v29 = vmul.f32 %v3197_v1, %v2328_v28 }
0x17b5   :  { %2332 = vrot.lane.b32.xlu1 %v2330_v29, %s3255_s1 }
0x1827   :  { %v2333_v30 = vpop.permute.xlu1 %2332 }
0x1828   :  { %v2335_v31 = vadd.f32 %v2333_v30, %v2325_v41 }
0x182a   :  { %3198 = vtanh.f32 %v2335_v31 }
0x1834   :  { %v3199_v40 = vpop.eup %3198 }
0x1835   :  { %2338 = vrot.lane.b32.xlu0 %v3199_v40, %s3254_s0 }
0x18a7   :  { %v2339_v42 = vpop.permute.xlu0 %2338 }
0x18a8   :  { %v2341_v43 = vmul.f32 %v3197_v1, %v2339_v42 }
0x18aa   :  { %2347 = vrot.lane.b32.xlu1 %v2341_v43, %s3255_s1 }
0x191c   :  { %v2348_v44 = vpop.permute.xlu1 %2347 }
0x191d   :  { %2887 = vmatmul.mubr.msk.f32.vlgmr.msra.gmra.mrb[16].mxu1 %vm138_vm2, %v2348_v44 }
0x19f0   :  { %v2417_v47 = vpop.f32.mrb[16].mxu1 }
0x19f1   :  { %v2418_v48 = vadd.f32 %v2479_v46, %v2417_v47  ;;  %v2888_v49 = vpop.f32.mrb[17].mxu1 }
0x19f3   :  { %2421 = vst [vmem:[#allocation5] sm:$0x3] %v2418_v48 }
0x19f4   :  { %3233 = shalt.err (!%p3230_p12)
}
0x19f5   :  { %s3234_s4 = scalar_lea.hbm %s3627_s2, 32 }
0x19f6   :  { %p3235_p13 = scmp.ne.s32.totalorder %s3627_s2, %s3234_s4  ;;  %p3238_p0 = scmp.lt.u32.totalorder %s3234_s4, %s3627_s2 }
0x19f8   :  { %p3240_p1 = pnand %p3238_p0, %p3235_p13 }
0x19fa   :  { %3243 = shalt.err (!%p3240_p1)
}
0x19fb   :  { %2431 = dma.vmem_to_hbm [thread:$0]  %s2429_s28, 32, %s3627_s2, [#allocation4]  }
0x19fc   :  { %3246 = dma.done.wait [#allocation4], 32  }
0x19fd   :  { %3247 = vsyncadd [#allocation4], 4294967264 }
0x19fe   :  { %2435 = vsyncpa [#allocation3], 1 }
0x19ff   :  { %2436 = vsyncpa [#allocation4], 1 }

</bundles_post_ra>
